<compile_context>
chip_gen: v5e
topology: v5e:2x2
jax: 0.10.0
libtpu: 0.0.40
codegen_flags: <defaults>
</compile_context>

<pallas_src>
import functools

import jax
import jax.numpy as jnp
from jax.experimental import pallas as pl
from jax.experimental.pallas import tpu as pltpu


def _transition_kernel(x_ref, ss_ref, w_ref, o_ref, *, elem_dtype):
    # x_ref:  (2*TH, W, Cin)   channels-last activation slab (pre-pool rows)
    # ss_ref: (2, Cin) f32     row 0 = BN scale (gamma/sqrt(var+eps)), row 1 = BN shift
    # w_ref:  (Cin, Cout)      1x1 conv weight (0.25 avg-pool factor folded in), input dtype
    # o_ref:  (TH, W//2, Cout)
    # elem_dtype: static; dtype for the BN/ReLU/pool elementwise path
    #             (bf16 on v6e/v7x when the input is bf16, else f32).
    h2, w, cin = x_ref.shape
    th = h2 // 2
    wp = w // 2
    cout = w_ref.shape[1]

    # Folded BatchNorm + ReLU (VPU elementwise in elem_dtype).
    x = x_ref[...].astype(elem_dtype)                               # (2TH, W, Cin)
    scale = ss_ref[0:1, :].reshape(1, 1, cin).astype(elem_dtype)
    shift = ss_ref[1:2, :].reshape(1, 1, cin).astype(elem_dtype)
    y = jnp.maximum(x * scale + shift, 0.0)                         # (2TH, W, Cin)

    # AvgPool2d(2,2) *before* the 1x1 conv (1/4 factor folded into the weight).
    # H-pair pool first: adds two contiguous (W, Cin) slabs -> pure VPU, no relayout.
    z = y.reshape(th, 2, w, cin).sum(axis=1)                        # (TH, W, Cin)
    # W-pair pool second: sublane pair-reduction on the already-halved data.
    z = z.reshape(th * wp, 2, cin).sum(axis=1)                      # (TH*Wp, Cin)

    # 1x1 conv == channel matmul on the MXU.  Operands stay in the input dtype
    # (bf16 inputs hit the bf16 MXU rate); accumulate in f32.
    z = z.astype(x_ref.dtype)
    out = jnp.dot(z, w_ref[...], preferred_element_type=jnp.float32)  # (TH*Wp, Cout)

    o_ref[...] = out.reshape(th, wp, cout).astype(o_ref.dtype)


def _tpu_config():
    """Best-effort chip-generation detection.

    Returns (vmem_limit_bytes, target_slab_bytes, has_bf16_vpu, num_tensorcores).
    """
    kind = ""
    try:
        kind = jax.devices()[0].device_kind.lower()
    except Exception:  # pragma: no cover - defensive
        pass
    mib = 1024 * 1024
    if "v7" in kind:
        # 64 MiB VMEM per TC, 2 TCs/chip, bf16 VPU.
        return 48 * mib, 3 * mib, True, 2
    if "v6" in kind:
        # 128 MiB VMEM, bf16 VPU.
        return 64 * mib, 8 * mib, True, 1
    if "v5" in kind:
        # 128 MiB VMEM, no bf16 VALU (v5e): keep f32 elementwise (HBM-bound anyway).
        return 64 * mib, 8 * mib, False, 1
    # Unknown chip / emulator: conservative defaults that also fit a 64 MiB part.
    return 48 * mib, 4 * mib, False, 1


def _choose_row_tile(Hp, Wp, W, Cin, itemsize, target_bytes, want_two_steps):
    """Pick TH (pooled output rows per grid step).

    Prefers the whole image (TH = Hp) whenever the (2*TH, W, Cin) input slab fits
    the per-generation budget (parallel grid units then come from the batch
    axis).  Only splits an already-fitting image when `want_two_steps` (v7x with
    batch == 1) AND the split keeps the matmul M = TH*Wp >= 256 rows, so we never
    degenerate into tiny-M matmuls and tiny DMAs.
    """
    divisors = [th for th in range(1, Hp + 1) if Hp % th == 0]
    slab_bytes = lambda th: 2 * th * W * Cin * itemsize
    fitting = [th for th in divisors if slab_bytes(th) <= target_bytes]
    if not fitting:
        # Even a single pooled row exceeds the slab budget (huge W*Cin); fall back
        # to TH=1 and rely on the raised vmem_limit.  A W-axis tiling fallback
        # (tiles of W in multiples of 2 to keep pooling pairs intact) would go here.
        return 1
    th = max(fitting)
    if want_two_steps and Hp // th < 2:
        alt = [t for t in fitting if Hp // t >= 2 and t * Wp >= 256]
        if alt:
            th = max(alt)
    return th


@functools.partial(jax.jit, static_argnames=("eps",))
def transition_block_nhwc(x, gamma, beta, running_mean, running_var, conv_w, eps=1e-5):
    """Channels-last TransitionBlock.

    x:      (N, H, W, Cin)    activations (NHWC, the recommended layout for the chain)
    conv_w: (Cout, Cin, 1, 1) PyTorch OIHW 1x1 conv weight (no bias)
    returns (N, H//2, W//2, Cout) in x.dtype.
    """
    N, H, W, Cin = x.shape
    Cout = conv_w.shape[0]
    assert H % 2 == 0 and W % 2 == 0, "AvgPool2d(2,2) needs even H and W"

    vmem_limit, target_slab, has_bf16_vpu, num_tc = _tpu_config()
    elem_dtype = (jnp.bfloat16
                  if (x.dtype == jnp.bfloat16 and has_bf16_vpu)
                  else jnp.float32)

    # Fold eval-mode BatchNorm into a per-channel scale/shift (single (2, Cin) operand,
    # computed in f32; cast once inside the kernel to the elementwise dtype).
    scale = (gamma.astype(jnp.float32)
             / jnp.sqrt(running_var.astype(jnp.float32) + eps))
    shift = beta.astype(jnp.float32) - running_mean.astype(jnp.float32) * scale
    ss = jnp.stack([scale, shift], axis=0)                          # (2, Cin) f32

    # 1x1 conv weight -> (Cin, Cout) in the input dtype; fold the avg-pool 1/4
    # factor (exact power-of-two scaling) so the kernel pools with plain sums.
    w = (conv_w.reshape(Cout, Cin).T.astype(jnp.float32) * 0.25).astype(x.dtype)

    Hp, Wp = H // 2, W // 2
    TH = _choose_row_tile(Hp, Wp, W, Cin, x.dtype.itemsize, target_slab,
                          want_two_steps=(N == 1 and num_tc >= 2))
    grid = (N, Hp // TH)

    cost = pl.CostEstimate(
        flops=int(2 * N * Hp * Wp * Cin * Cout),
        transcendentals=0,
        bytes_accessed=int(N * H * W * Cin * x.dtype.itemsize
                           + N * Hp * Wp * Cout * x.dtype.itemsize
                           + Cin * Cout * w.dtype.itemsize
                           + 2 * Cin * 4),
    )

    kernel = functools.partial(_transition_kernel, elem_dtype=elem_dtype)

    out = pl.pallas_call(
        kernel,
        out_shape=jax.ShapeDtypeStruct((N, Hp, Wp, Cout), x.dtype),
        grid_spec=pltpu.PrefetchScalarGridSpec(
            num_scalar_prefetch=0,
            grid=grid,
            in_specs=[
                pl.BlockSpec((pl.Squeezed(), 2 * TH, W, Cin),
                             lambda n, h: (n, h, 0, 0)),
                pl.BlockSpec((2, Cin), lambda n, h: (0, 0)),
                pl.BlockSpec((Cin, Cout), lambda n, h: (0, 0)),
            ],
            out_specs=pl.BlockSpec((pl.Squeezed(), TH, Wp, Cout),
                                   lambda n, h: (n, h, 0, 0)),
        ),
        compiler_params=pltpu.CompilerParams(
            dimension_semantics=("parallel", "parallel"),
            vmem_limit_bytes=vmem_limit,
        ),
        cost_estimate=cost,
    )(x, ss, w)
    return out


@functools.partial(jax.jit, static_argnames=("eps",))
def transition_block(x_nchw, gamma, beta, running_mean, running_var, conv_w, eps=1e-5):
    """PyTorch-layout (NCHW) compatibility wrapper.

    NOTE: for a full DenseNet chain prefer `transition_block_nhwc` and keep the
    activations channels-last end-to-end; the boundary transposes below are full
    HBM round trips and exist only for drop-in NCHW compatibility.
    """
    x = jnp.transpose(x_nchw, (0, 2, 3, 1))
    out = transition_block_nhwc(x, gamma, beta, running_mean, running_var, conv_w, eps=eps)
    return jnp.transpose(out, (0, 3, 1, 2))


def _reference_nchw(x, gamma, beta, mean, var, conv_w, eps=1e-5):
    # Pure-JAX PyTorch-semantics reference (eval-mode BN), NCHW throughout.
    inv = 1.0 / jnp.sqrt(var + eps)
    xn = (x - mean[None, :, None, None]) * inv[None, :, None, None]
    xn = xn * gamma[None, :, None, None] + beta[None, :, None, None]
    xn = jnp.maximum(xn, 0.0)
    w = conv_w[:, :, 0, 0]                                          # (Cout, Cin)
    y = jnp.einsum("nchw,oc->nohw", xn, w)
    N, Co, H, W = y.shape
    return y.reshape(N, Co, H // 2, 2, W // 2, 2).mean(axis=(3, 5))


if __name__ == "__main__":
    key = jax.random.PRNGKey(0)
    N, Cin, H, W = 2, 256, 16, 16        # DenseNet-style transition: Cout = Cin // 2
    Cout = 128                            # Cout = 128 -> lane-dense output stores

    k = jax.random.split(key, 6)
    # Channels-last activations: the kernel's native layout (no transposes on this path).
    x_nhwc = jax.random.normal(k[0], (N, H, W, Cin), dtype=jnp.float32)

    # Eval-mode BatchNorm2d params/stats + 1x1 Conv2d weight (no bias).
    gamma = 1.0 + 0.1 * jax.random.normal(k[1], (Cin,), dtype=jnp.float32)
    beta = 0.1 * jax.random.normal(k[2], (Cin,), dtype=jnp.float32)
    running_mean = 0.05 * jax.random.normal(k[3], (Cin,), dtype=jnp.float32)
    running_var = 1.0 + 0.1 * jax.nn.softplus(
        jax.random.normal(k[4], (Cin,), dtype=jnp.float32))
    conv_w = jax.random.normal(k[5], (Cout, Cin, 1, 1), dtype=jnp.float32) * (1.0 / Cin) ** 0.5

    # --- primary NHWC path ---
    out = transition_block_nhwc(x_nhwc, gamma, beta, running_mean, running_var, conv_w)
    out = jax.block_until_ready(out)
    assert out.shape == (N, H // 2, W // 2, Cout), out.shape

    # PyTorch-semantics reference (transposes here are test glue only).
    x_nchw = jnp.transpose(x_nhwc, (0, 3, 1, 2))
    ref_nchw = _reference_nchw(x_nchw, gamma, beta, running_mean, running_var, conv_w)
    ref_nhwc = jnp.transpose(ref_nchw, (0, 2, 3, 1))
    err = float(jnp.max(jnp.abs(out - ref_nhwc)))
    assert jnp.allclose(out, ref_nhwc, atol=1e-4, rtol=1e-4), err

    # --- NCHW compatibility wrapper ---
    out_nchw = jax.block_until_ready(
        transition_block(x_nchw, gamma, beta, running_mean, running_var, conv_w))
    assert out_nchw.shape == (N, Cout, H // 2, W // 2), out_nchw.shape
    err2 = float(jnp.max(jnp.abs(out_nchw - ref_nchw)))
    assert jnp.allclose(out_nchw, ref_nchw, atol=1e-4, rtol=1e-4), err2

    # --- bf16 path: bf16 operands on the MXU (f32 accumulation); on v6e/v7x the
    #     BN/ReLU/pool elementwise work also runs in packed bf16 on the VPU ---
    out_bf16 = jax.block_until_ready(
        transition_block_nhwc(x_nhwc.astype(jnp.bfloat16), gamma, beta,
                              running_mean, running_var, conv_w))
    assert out_bf16.dtype == jnp.bfloat16
    err3 = float(jnp.max(jnp.abs(out_bf16.astype(jnp.float32) - ref_nhwc)))
    assert jnp.allclose(out_bf16.astype(jnp.float32), ref_nhwc, atol=0.1, rtol=0.1), err3

    print("KERNEL_OK")
</pallas_src>

<mosaic_0001>
module attributes {stable_mosaic.version = 11 : i64} {
  func.func @_transition_kernel(%arg0: i32, %arg1: i32, %arg2: memref<1x16x16x256xf32, #tpu.memory_space<vmem>>, %arg3: memref<2x256xf32, #tpu.memory_space<vmem>>, %arg4: memref<256x128xf32, #tpu.memory_space<vmem>>, %arg5: memref<1x8x8x128xf32, #tpu.memory_space<vmem>>) attributes {dimension_semantics = [#tpu.dimension_semantics<parallel>, #tpu.dimension_semantics<parallel>], iteration_bounds = array<i64: 2, 1>, scalar_prefetch = 0 : i64, scratch_operands = 0 : i64, tpu.core_type = #tpu.core_type<tc>, window_params = [{transform_indices = @transform_0, window_bounds = array<i64: 1, 16, 16, 256>}, {pipeline_mode = #tpu.pipeline_mode<synchronous>, transform_indices = @transform_1, window_bounds = array<i64: 2, 256>}, {pipeline_mode = #tpu.pipeline_mode<synchronous>, transform_indices = @transform_2, window_bounds = array<i64: 256, 128>}, {transform_indices = @transform_3, window_bounds = array<i64: 1, 8, 8, 128>}]} {
    %c0 = arith.constant 0 : index
    %c0_0 = arith.constant 0 : index
    %c0_1 = arith.constant 0 : index
    %c0_2 = arith.constant 0 : index
    %0 = vector.load %arg2[%c0, %c0_0, %c0_1, %c0_2] : memref<1x16x16x256xf32, #tpu.memory_space<vmem>>, vector<1x16x16x256xf32>
    %1 = vector.shape_cast %0 : vector<1x16x16x256xf32> to vector<16x16x256xf32>
    %c0_3 = arith.constant 0 : index
    %c0_4 = arith.constant 0 : index
    %2 = vector.load %arg3[%c0_3, %c0_4] : memref<2x256xf32, #tpu.memory_space<vmem>>, vector<1x256xf32>
    %3 = vector.shape_cast %2 : vector<1x256xf32> to vector<1x1x256xf32>
    %c1 = arith.constant 1 : index
    %c0_5 = arith.constant 0 : index
    %4 = vector.load %arg3[%c1, %c0_5] : memref<2x256xf32, #tpu.memory_space<vmem>>, vector<1x256xf32>
    %5 = vector.shape_cast %4 : vector<1x256xf32> to vector<1x1x256xf32>
    %6 = vector.broadcast %3 : vector<1x1x256xf32> to vector<16x16x256xf32>
    %7 = arith.mulf %1, %6 : vector<16x16x256xf32>
    %8 = vector.broadcast %5 : vector<1x1x256xf32> to vector<16x16x256xf32>
    %9 = arith.addf %7, %8 : vector<16x16x256xf32>
    %cst = arith.constant 0.000000e+00 : f32
    %10 = vector.broadcast %cst : f32 to vector<16x16x256xf32>
    %11 = arith.maximumf %9, %10 : vector<16x16x256xf32>
    %12 = vector.shape_cast %11 : vector<16x16x256xf32> to vector<8x2x16x256xf32>
    %cst_6 = arith.constant dense<0.000000e+00> : vector<8x16x256xf32>
    %13 = vector.multi_reduction <add>, %12, %cst_6 [1] : vector<8x2x16x256xf32> to vector<8x16x256xf32>
    %14 = vector.shape_cast %13 : vector<8x16x256xf32> to vector<64x2x256xf32>
    %cst_7 = arith.constant dense<0.000000e+00> : vector<64x256xf32>
    %15 = vector.multi_reduction <add>, %14, %cst_7 [1] : vector<64x2x256xf32> to vector<64x256xf32>
    %c0_8 = arith.constant 0 : index
    %c0_9 = arith.constant 0 : index
    %16 = vector.load %arg4[%c0_8, %c0_9] : memref<256x128xf32, #tpu.memory_space<vmem>>, vector<256x128xf32>
    %cst_10 = arith.constant dense<0.000000e+00> : vector<64x128xf32>
    %17 = tpu.matmul %15, %16, %cst_10 {dimension_numbers = #tpu.dot_dimension_numbers<[1], [0], [0], [1], [0, 0, 1, 1], [], []>} : vector<64x256xf32>, vector<256x128xf32>, vector<64x128xf32> -> vector<64x128xf32>
    %18 = vector.shape_cast %17 : vector<64x128xf32> to vector<8x8x128xf32>
    %c0_11 = arith.constant 0 : index
    %c0_12 = arith.constant 0 : index
    %c0_13 = arith.constant 0 : index
    %c0_14 = arith.constant 0 : index
    %19 = vector.load %arg5[%c0_11, %c0_12, %c0_13, %c0_14] : memref<1x8x8x128xf32, #tpu.memory_space<vmem>>, vector<1x8x8x128xf32>
    %20 = vector.shape_cast %19 : vector<1x8x8x128xf32> to vector<8x8x128xf32>
    %21 = vector.shape_cast %18 : vector<8x8x128xf32> to vector<1x8x8x128xf32>
    tpu.vector_store %arg5[%c0_11, %c0_12, %c0_13, %c0_14], %21 {strides = array<i32>} : memref<1x8x8x128xf32, #tpu.memory_space<vmem>>, vector<1x8x8x128xf32>,
    return
  }
  func.func @transform_0(%arg0: i32, %arg1: i32) -> (i32, i32, i32, i32) {
    %c0_i32 = arith.constant 0 : i32
    %c0_i32_0 = arith.constant 0 : i32
    %c0_i32_1 = arith.constant 0 : i32
    return %arg0, %arg1, %c0_i32, %c0_i32_0 : i32, i32, i32, i32
  }
  func.func @transform_1(%arg0: i32, %arg1: i32) -> (i32, i32) {
    %c0_i32 = arith.constant 0 : i32
    %c0_i32_0 = arith.constant 0 : i32
    %c0_i32_1 = arith.constant 0 : i32
    return %c0_i32, %c0_i32_0 : i32, i32
  }
  func.func @transform_2(%arg0: i32, %arg1: i32) -> (i32, i32) {
    %c0_i32 = arith.constant 0 : i32
    %c0_i32_0 = arith.constant 0 : i32
    %c0_i32_1 = arith.constant 0 : i32
    return %c0_i32, %c0_i32_0 : i32, i32
  }
  func.func @transform_3(%arg0: i32, %arg1: i32) -> (i32, i32, i32, i32) {
    %c0_i32 = arith.constant 0 : i32
    %c0_i32_0 = arith.constant 0 : i32
    %c0_i32_1 = arith.constant 0 : i32
    return %arg0, %arg1, %c0_i32, %c0_i32_0 : i32, i32, i32, i32
  }
}

</mosaic_0001>

<bundles_post_ra>
// kernel: transition_block_nhwc.1
= control target key start
LH: loop header
LB: loop body
LE: loop exit
PB: predicated region body
PF: predicated region fallthrough
CT: control target
= control target key end

     0   :  { %8 = vsyncpa [#allocation3], 0  ;;  %s3889_s0 = inlined_call_operand.vmem [shape: f32[2,16,16,256], index: 0, kind: input, shape index: {}]   ;;  %s3890_s1 = inlined_call_operand.vmem [shape: f32[2,256], index: 1, kind: input, shape index: {}]   ;;  %s3891_s2 = inlined_call_operand.vmem [shape: f32[256,128], index: 2, kind: input, shape index: {}]   ;;  %s3892_s3 = inlined_call_operand.hbm [shape: f32[2,8,8,128], index: 3, kind: output, shape index: {}]  }
   0x1   :  { %10 = vsyncpa [#allocation3 + $0x1], 0  ;;  %s2577_s12 = smov 0   ;;  %s2579_s13 = smov 0  }
   0x2   :  { %s2581_s14 = smov 0   ;;  %s2583_s15 = smov 0  }
   0x3   :  { %s2585_s16 = smov 0   ;;  %s2587_s17 = smov 0  }
   0x4 LB: > { %s2370_s18 = sadd.s32 4294967295, %s2553_s17   ;;  %s2371_s19 = sadd.s32 4294967294, %s2553_s17   ;;  %s2553_s17 = sphi %s2587_s17, %s16_s17   ;;  %s2549_s16 = sphi %s2585_s16, %s4041_s16   ;;  %s2545_s15 = sphi %s2583_s15, %s4040_s15   ;;  %s2541_s14 = sphi %s2581_s14, %s4039_s14   ;;  %s2537_s13 = sphi %s2579_s13, %s4038_s13   ;;  %s2533_s12 = sphi %s2577_s12, %s4037_s12  }
   0x5   : > { %s28_s20 = sadd.s32 1, %s2549_s16  ;;  %s107_s21 = sadd.s32 1, %s2541_s14 }
   0x6   : > { %p30_p0 = scmp.ge.s32.totalorder %s28_s20, 2  ;;  %p117_p1 = scmp.ne.s32.totalorder %s2541_s14, %s2537_s13 }
   0x7   : > { %p118_p2 = scmp.eq.s32.totalorder %s2370_s18, 1  ;;  %p123_p3 = scmp.ne.s32.totalorder %s2537_s13, %s2533_s12 }
   0x8   : > { %s4043_s20 = smov (%p30_p0, %s28_s20), 0  ;;  %p124_p5 = scmp.eq.s32.totalorder %s2371_s19, 1 }
   0x9   : > { %p2617_p4 = por %p118_p2, %p117_p1  ;;  %s102_s23 = ssub.s32 %s2549_s16, %s4043_s20 }
   0xa   : > { %p2374_p6 = scmp.ge.s32.totalorder %s2553_s17, 1  ;;  %p105_p7 = scmp.eq.s32.totalorder %s102_s23, 0 }
   0xb   : > { %p2624_p8 = por %p124_p5, %p123_p3  ;;  %p162_p9 = scmp.lt.s32.totalorder %s2553_s17, 3 }
   0xc   : > { %s2630_s25 = scalar_select %p105_p7, %s2541_s14, %s107_s21  }
   0xd   : > { %p163_p10 = pnand %p2374_p6, %p162_p9 }
   0xf   : > { %166 = sbr.rel (%p163_p10) target bundleno = 638 (0x27e), region = 32 }
  0x14   : > { %v1900_v0 = vld [vmem:[%s3891_s2 + $0x78] sm:$0xff]  ;;  %v1899_v2 = vld [vmem:[%s3891_s2 + $0x70] sm:$0xff]  ;;  %v1898_v4 = vld [vmem:[%s3891_s2 + $0x68] sm:$0xff]  ;;  %p192_p11 = scmp.lt.s32.totalorder %s2545_s15, 1  ;;  %vm552_vm0 = vcmask 1041408   ;;  %vm554_vm1 = vcmask 1043458  }
  0x15   : > { %v1916_v1 = vld [vmem:[%s3891_s2 + $0xf8] sm:$0xff]  ;;  %2386 = vmatpush.msra.mxu2 %v1900_v0  ;;  %v1915_v3 = vld [vmem:[%s3891_s2 + $0xf0] sm:$0xff]  ;;  %v1914_v5 = vld [vmem:[%s3891_s2 + $0xe8] sm:$0xff]  ;;  %2180 = vmatpush.msra.mxu0 %v1900_v0  ;;  %vm557_vm2 = vcmask 1045508   ;;  %vm560_vm3 = vcmask 1045504   ;;  %vm2045_vm4 = vcmask 1041409  }
  0x16   : > { %2402 = vmatpush.msra.mxu3 %v1916_v1  ;;  %2221 = vmatpush.msra.mxu1 %v1916_v1  ;;  %v1897_v6 = vld [vmem:[%s3891_s2 + $0x60] sm:$0xff]  ;;  %v1896_v8 = vld [vmem:[%s3891_s2 + $0x58] sm:$0xff]  ;;  %v1895_v10 = vld [vmem:[%s3891_s2 + $0x50] sm:$0xff]  ;;  %s193_s18 = scalar_select %p192_p11, %s2545_s15, 1  ;;  %vm2047_vm5 = vcmask 1042434   ;;  %vm2049_vm6 = vcmask 1043459  }
  0x17   : > { %2387 = vmatpush.msra.mxu2 %v1899_v2  ;;  %v1913_v7 = vld [vmem:[%s3891_s2 + $0xe0] sm:$0xff]  ;;  %2181 = vmatpush.msra.mxu0 %v1899_v2  ;;  %v1912_v9 = vld [vmem:[%s3891_s2 + $0xd8] sm:$0xff]  ;;  %v1911_v11 = vld [vmem:[%s3891_s2 + $0xd0] sm:$0xff]  ;;  %vm2051_vm7 = vcmask 1044484   ;;  %vm2053_vm8 = vcmask 1045509   ;;  %vm2055_vm9 = vcmask 1046534  }
  0x18   : > { %2403 = vmatpush.msra.mxu3 %v1915_v3  ;;  %2222 = vmatpush.msra.mxu1 %v1915_v3  ;;  %v1894_v12 = vld [vmem:[%s3891_s2 + $0x48] sm:$0xff]  ;;  %v1893_v14 = vld [vmem:[%s3891_s2 + $0x40] sm:$0xff]  ;;  %v1892_v16 = vld [vmem:[%s3891_s2 + $0x38] sm:$0xff]  ;;  %s2384_s19 = sshll.u32 %s193_s18, 9  ;;  %vm2057_vm10 = vcmask 1047559   ;;  %s188_s4 = sand.u32 1, %s2537_s13  }
  0x19   : > { %2388 = vmatpush.msra.mxu2 %v1898_v4  ;;  %2182 = vmatpush.msra.mxu0 %v1898_v4  ;;  %v1910_v13 = vld [vmem:[%s3891_s2 + $0xc8] sm:$0xff]  ;;  %v1909_v15 = vld [vmem:[%s3891_s2 + $0xc0] sm:$0xff]  ;;  %v1908_v17 = vld [vmem:[%s3891_s2 + $0xb8] sm:$0xff]  ;;  %s2736_s28 = scalar_lea.vmem %s3889_s0, %s2384_s19  ;;  %s2375_s5 = sshll.u32 %s188_s4, 6 }
  0x1a   : > { %2404 = vmatpush.msra.mxu3 %v1914_v5  ;;  %2223 = vmatpush.msra.mxu1 %v1914_v5  ;;  %v1891_v18 = vld [vmem:[%s3891_s2 + $0x30] sm:$0xff]  ;;  %v1890_v20 = vld [vmem:[%s3891_s2 + $0x28] sm:$0xff]  ;;  %v1889_v22 = vld [vmem:[%s3891_s2 + $0x20] sm:$0xff]  ;;  %s3833_s6 = scalar_lea.vmem [#allocation2], %s2375_s5  ;;  %s2385_s7 = sshll.u32 %s2545_s15, 6 }
  0x1b   : > { %2389 = vmatpush.msra.mxu2 %v1897_v6  ;;  %2183 = vmatpush.msra.mxu0 %v1897_v6  ;;  %v1907_v19 = vld [vmem:[%s3891_s2 + $0xb0] sm:$0xff]  ;;  %v1906_v21 = vld [vmem:[%s3891_s2 + $0xa8] sm:$0xff]  ;;  %v1905_v23 = vld [vmem:[%s3891_s2 + $0xa0] sm:$0xff]  ;;  %s2284_s10 = scalar_lea.hbm %s3892_s3, %s2385_s7  ;;  %s2285_s11 = sshll.u32 %s3833_s6, 4  ;;  %s2286_s11 = int_to_ptr.vmem [resolvable:$true] %s2285_s11 }
  0x1c   : > { %2405 = vmatpush.msra.mxu3 %v1913_v7  ;;  %2224 = vmatpush.msra.mxu1 %v1913_v7  ;;  %v1888_v24 = vld [vmem:[%s3891_s2 + $0x18] sm:$0xff]  ;;  %v1887_v26 = vld [vmem:[%s3891_s2 + $0x10] sm:$0xff]  ;;  %v1886_v28 = vld [vmem:[%s3891_s2 + $0x8] sm:$0xff]  ;;  %s2287_s18 = sshll.u32 %s2284_s10, 4  ;;  %s2271_s19 = scalar_lea.sflag [#allocation3], %s188_s4  ;;  %s2288_s18 = int_to_ptr.hbm [resolvable:$true] %s2287_s18 }
  0x1d   : > { %2390 = vmatpush.msra.mxu2 %v1896_v8  ;;  %2184 = vmatpush.msra.mxu0 %v1896_v8  ;;  %v1904_v25 = vld [vmem:[%s3891_s2 + $0x98] sm:$0xff]  ;;  %v1903_v27 = vld [vmem:[%s3891_s2 + $0x90] sm:$0xff]  ;;  %v1902_v29 = vld [vmem:[%s3891_s2 + $0x88] sm:$0xff]  ;;  %s2489_s21 = sshra.s32 %s2288_s18, 4  ;;  %s2495_s27 = scalar_lea.hbm %s3892_s3, 128  ;;  %s2490_s21 = int_to_ptr.hbm [resolvable:$true] %s2489_s21 }
  0x1e   : > { %2406 = vmatpush.msra.mxu3 %v1912_v9  ;;  %2225 = vmatpush.msra.mxu1 %v1912_v9  ;;  %v1885_v30 = vld [vmem:[%s3891_s2] sm:$0xff]  ;;  %v204_v34 = vld [vmem:[%s2736_s28 + $0x8] sm:$0xff]  ;;  %v206_v52 = vld [vmem:[%s2736_s28 + $0x18] sm:$0xff]  ;;  %s2491_s23 = scalar_lea.hbm %s2490_s21, 64  ;;  %p2496_p1 = scmp.lt.s32.totalorder %s2490_s21, %s3892_s3 }
  0x1f   : > { %2391 = vmatpush.msra.mxu2 %v1895_v10  ;;  %2185 = vmatpush.msra.mxu0 %v1895_v10  ;;  %v1901_v31 = vld [vmem:[%s3891_s2 + $0x80] sm:$0xff]  ;;  %v208_v35 = vld [vmem:[%s2736_s28 + $0x28] sm:$0xff]  ;;  %v210_v53 = vld [vmem:[%s2736_s28 + $0x38] sm:$0xff]  ;;  %p2492_p12 = scmp.ne.s32.totalorder %s2490_s21, %s2491_s23  ;;  %p2497_p2 = scmp.lt.s32.totalorder %s2495_s27, %s2491_s23 }
  0x20   : > { %2407 = vmatpush.msra.mxu3 %v1911_v11  ;;  %2226 = vmatpush.msra.mxu1 %v1911_v11  ;;  %v267_v32 = vld [vmem:[%s3890_s1] ss:$2 sm:$0x3]  ;;  %v2378_v36 = vld [vmem:[%s3890_s1 + $0x1] ss:$2 sm:$0x3] }
  0x21   : > { %2392 = vmatpush.msra.mxu2 %v1894_v12  ;;  %2186 = vmatpush.msra.mxu0 %v1894_v12  ;;  %v2738_v33 = vperm.slane %v267_v32, 1  ;;  %v2745_v37 = vperm.slane %v267_v32, 0  ;;  %v2749_v40 = vperm.slane %v2378_v36, 1  ;;  %v203_v41 = vld [vmem:[%s2736_s28] sm:$0xff]  ;;  %v2753_v43 = vperm.slane %v2378_v36, 0  ;;  %v205_v57 = vld [vmem:[%s2736_s28 + $0x10] sm:$0xff]  ;;  %p2493_p13 = pnand %p2492_p12, %p2617_p4  ;;  %p2498_p3 = por %p2497_p2, %p2496_p1 }
  0x22   : > { %2408 = vmatpush.msra.mxu3 %v1910_v13  ;;  %2227 = vmatpush.msra.mxu1 %v1910_v13  ;;  %v207_v42 = vld [vmem:[%s2736_s28 + $0x20] sm:$0xff]  ;;  %v209_v60 = vld [vmem:[%s2736_s28 + $0x30] sm:$0xff]  ;;  %v212_v12 = vld [vmem:[%s2736_s28 + $0x48] sm:$0xff] }
  0x23   : > { %2393 = vmatpush.msra.mxu2 %v1893_v14  ;;  %2187 = vmatpush.msra.mxu0 %v1893_v14  ;;  %v276_v38 = vmul.f32 %v2738_v33, %v204_v34  ;;  %v280_v39 = vmul.f32 %v2738_v33, %v208_v35  ;;  %v275_v44 = vmul.f32 %v2745_v37, %v203_v41  ;;  %v216_v13 = vld [vmem:[%s2736_s28 + $0x68] sm:$0xff]  ;;  %p2494_p0 = pneg %p2493_p13 }
  0x24   : > { %2409 = vmatpush.msra.mxu3 %v1909_v15  ;;  %2228 = vmatpush.msra.mxu1 %v1909_v15  ;;  %v279_v45 = vmul.f32 %v2745_v37, %v207_v42  ;;  %v278_v58 = vmul.f32 %v2738_v33, %v206_v52  ;;  %v282_v59 = vmul.f32 %v2738_v33, %v210_v53  ;;  %v218_v52 = vld [vmem:[%s2736_s28 + $0x78] sm:$0xff] }
  0x25   : > { %2394 = vmatpush.msra.mxu2 %v1892_v16  ;;  %2188 = vmatpush.msra.mxu0 %v1892_v16  ;;  %v345_v46 = vadd.f32 %v2749_v40, %v276_v38  ;;  %v349_v47 = vadd.f32 %v2749_v40, %v280_v39  ;;  %v344_v48 = vadd.f32 %v2753_v43, %v275_v44  ;;  %p2499_p5 = pnand %p2498_p3, %p2494_p0 }
  0x26   : > { %2410 = vmatpush.msra.mxu3 %v1908_v17  ;;  %2229 = vmatpush.msra.mxu1 %v1908_v17  ;;  %v348_v49 = vadd.f32 %v2753_v43, %v279_v45  ;;  %v277_v63 = vmul.f32 %v2745_v37, %v205_v57  ;;  %v281_v0 = vmul.f32 %v2745_v37, %v209_v60 }
  0x27   : > { %2395 = vmatpush.msra.mxu2 %v1891_v18  ;;  %2189 = vmatpush.msra.mxu0 %v1891_v18  ;;  %v409_v50 = vmax.f32 %v345_v46, 0.0  ;;  %v413_v51 = vmax.f32 %v349_v47, 0.0  ;;  %v408_v54 = vmax.f32 %v344_v48, 0.0  ;;  %v347_v1 = vadd.f32 %v2749_v40, %v278_v58 }
  0x28   : > { %2411 = vmatpush.msra.mxu3 %v1907_v19  ;;  %2230 = vmatpush.msra.mxu1 %v1907_v19  ;;  %v412_v55 = vmax.f32 %v348_v49, 0.0  ;;  %v351_v2 = vadd.f32 %v2749_v40, %v282_v59  ;;  %v346_v5 = vadd.f32 %v2753_v43, %v277_v63  ;;  %v350_v7 = vadd.f32 %v2753_v43, %v281_v0 }
  0x29   : > { %2396 = vmatpush.msra.mxu2 %v1890_v20  ;;  %2190 = vmatpush.msra.mxu0 %v1890_v20  ;;  %v473_v56 = vadd.f32 %v413_v51, %v409_v50  ;;  %v411_v8 = vmax.f32 %v347_v1, 0.0  ;;  %v284_v20 = vmul.f32 %v2738_v33, %v212_v12  ;;  %v214_v51 = vld [vmem:[%s2736_s28 + $0x58] sm:$0xff]  ;;  %v290_v59 = vmul.f32 %v2738_v33, %v218_v52  ;;  %v213_v1 = vld [vmem:[%s2736_s28 + $0x50] sm:$0xff] }
  0x2a   : > { %2412 = vmatpush.msra.mxu3 %v1906_v21  ;;  %2231 = vmatpush.msra.mxu1 %v1906_v21  ;;  %v472_v61 = vadd.f32 %v412_v55, %v408_v54  ;;  %v415_v9 = vmax.f32 %v351_v2, 0.0  ;;  %v410_v14 = vmax.f32 %v346_v5, 0.0  ;;  %v414_v15 = vmax.f32 %v350_v7, 0.0  ;;  %v217_v2 = vld [vmem:[%s2736_s28 + $0x70] sm:$0xff] }
  0x2b   : > { %2397 = vmatpush.msra.mxu2 %v1889_v22  ;;  %2191 = vmatpush.msra.mxu0 %v1889_v22  ;;  %v536_v62 = vrot.slane %v473_v56, 6  ;;  %v288_v21 = vmul.f32 %v2738_v33, %v216_v13  ;;  %v286_v58 = vmul.f32 %v2738_v33, %v214_v51  ;;  %v289_v7 = vmul.f32 %v2745_v37, %v217_v2 }
  0x2c   : > { %2413 = vmatpush.msra.mxu3 %v1905_v23  ;;  %2232 = vmatpush.msra.mxu1 %v1905_v23  ;;  %v475_v16 = vadd.f32 %v415_v9, %v411_v8  ;;  %v474_v23 = vadd.f32 %v414_v15, %v410_v14 }
  0x2d   : > { %2398 = vmatpush.msra.mxu2 %v1888_v24  ;;  %2192 = vmatpush.msra.mxu0 %v1888_v24  ;;  %v553_v3 = vsel %vm552_vm0, %v472_v61, %v536_v62  ;;  %v555_v4 = vsel %vm554_vm1, %v472_v61, %v536_v62  ;;  %v558_v10 = vsel %vm557_vm2, %v472_v61, %v536_v62 }
  0x2e   : > { %2414 = vmatpush.msra.mxu3 %v1904_v25  ;;  %2233 = vmatpush.msra.mxu1 %v1904_v25  ;;  %v556_v6 = vrot.slane %v555_v4, 2  ;;  %668 = vst [vmem:[#allocation1] ss:$4 sm:$0xff] %v553_v3  ;;  %v561_v11 = vsel %vm560_vm3, %v536_v62, %v472_v61  ;;  %v559_v17 = vrot.slane %v558_v10, 4  ;;  %v537_v24 = vrot.slane %v475_v16, 6 }
  0x2f   : > { %2399 = vmatpush.msra.mxu2 %v1887_v26  ;;  %2193 = vmatpush.msra.mxu0 %v1887_v26  ;;  %v562_v18 = vrot.slane %v561_v11, 6  ;;  %v355_v3 = vadd.f32 %v2749_v40, %v286_v58  ;;  %v359_v4 = vadd.f32 %v2749_v40, %v290_v59 }
  0x30   : > { %2415 = vmatpush.msra.mxu3 %v1903_v27  ;;  %2234 = vmatpush.msra.mxu1 %v1903_v27  ;;  %672 = vst [vmem:[#allocation1 + $0x20] ss:$4 sm:$0xff] %v556_v6  ;;  %v211_v27 = vld [vmem:[%s2736_s28 + $0x40] sm:$0xff]  ;;  %v563_v38 = vsel %vm552_vm0, %v474_v23, %v537_v24  ;;  %v566_v49 = vsel %vm557_vm2, %v474_v23, %v537_v24 }
  0x31   : > { %2400 = vmatpush.msra.mxu2 %v1886_v28  ;;  %2194 = vmatpush.msra.mxu0 %v1886_v28  ;;  %v215_v28 = vld [vmem:[%s2736_s28 + $0x60] sm:$0xff]  ;;  %v283_v32 = vmul.f32 %v2745_v37, %v211_v27  ;;  %v568_v50 = vsel %vm560_vm3, %v537_v24, %v474_v23  ;;  %v567_v55 = vrot.slane %v566_v49, 4  ;;  %v285_v6 = vmul.f32 %v2745_v37, %v213_v1 }
  0x32   : > { %2416 = vmatpush.msra.mxu3 %v1902_v29  ;;  %2235 = vmatpush.msra.mxu1 %v1902_v29  ;;  %v353_v29 = vadd.f32 %v2749_v40, %v284_v20  ;;  %v287_v34 = vmul.f32 %v2745_v37, %v215_v28  ;;  %v569_v57 = vrot.slane %v568_v50, 6  ;;  %v419_v8 = vmax.f32 %v355_v3, 0.0 }
  0x33   : > { %2401 = vmatpush.msra.mxu2 %v1885_v30  ;;  %2195 = vmatpush.msra.mxu0 %v1885_v30  ;;  %v357_v30 = vadd.f32 %v2749_v40, %v288_v21  ;;  %v352_v45 = vadd.f32 %v2753_v43, %v283_v32  ;;  %v423_v9 = vmax.f32 %v359_v4, 0.0  ;;  %v354_v16 = vadd.f32 %v2753_v43, %v285_v6 }
  0x34   : > { %2417 = vmatpush.msra.mxu3 %v1901_v31  ;;  %2236 = vmatpush.msra.mxu1 %v1901_v31  ;;  %v564_v31 = vsel %vm554_vm1, %v474_v23, %v537_v24  ;;  %v417_v35 = vmax.f32 %v353_v29, 0.0  ;;  %v356_v46 = vadd.f32 %v2753_v43, %v287_v34  ;;  %v220_v23 = vld [vmem:[%s2736_s28 + $0x88] sm:$0xff] }
  0x35   : > { %v2779_v19 = vld.sshfl [vmem:[#allocation1] sm:$0xff pattern:$0x73625140]  ;;  %v2783_v22 = vld.sshfl [vmem:[#allocation1 + $0x8] sm:$0xff pattern:$0x73625140]  ;;  %v292_v32 = vmul.f32 %v2738_v33, %v220_v23 }
  0x36   : > { %675 = vst [vmem:[#allocation1] ss:$4 sm:$0xff] %v559_v17  ;;  %v421_v36 = vmax.f32 %v357_v30, 0.0  ;;  %v565_v39 = vrot.slane %v564_v31, 2  ;;  %v416_v53 = vmax.f32 %v352_v45, 0.0  ;;  %v420_v54 = vmax.f32 %v356_v46, 0.0 }
  0x37   : > { %v2785_v25 = vld.sshfl [vmem:[#allocation1 + $0x20] sm:$0xff pattern:$0x73625140]  ;;  %v2787_v26 = vld.sshfl [vmem:[#allocation1 + $0x28] sm:$0xff pattern:$0x73625140]  ;;  %v358_v17 = vadd.f32 %v2753_v43, %v289_v7  ;;  %v361_v49 = vadd.f32 %v2749_v40, %v292_v32 }
  0x38   : > { %678 = vst [vmem:[#allocation1 + $0x20] ss:$4 sm:$0xff] %v562_v18  ;;  %v477_v48 = vadd.f32 %v421_v36, %v417_v35  ;;  %v476_v62 = vadd.f32 %v420_v54, %v416_v53  ;;  %v479_v18 = vadd.f32 %v423_v9, %v419_v8  ;;  %v224_v24 = vld [vmem:[%s2736_s28 + $0xa8] sm:$0xff]  ;;  %v418_v27 = vmax.f32 %v354_v16, 0.0  ;;  %v219_v46 = vld [vmem:[%s2736_s28 + $0x80] sm:$0xff]  ;;  %v222_v7 = vld [vmem:[%s2736_s28 + $0x98] sm:$0xff] }
  0x39   : > { %v422_v28 = vmax.f32 %v358_v17, 0.0  ;;  %v296_v34 = vmul.f32 %v2738_v33, %v224_v24  ;;  %v291_v52 = vmul.f32 %v2745_v37, %v219_v46  ;;  %v425_v54 = vmax.f32 %v361_v49, 0.0  ;;  %v226_v8 = vld [vmem:[%s2736_s28 + $0xb8] sm:$0xff] }
  0x3a   : > { %v538_v56 = vrot.slane %v477_v48, 6  ;;  %v539_v30 = vrot.slane %v479_v18, 6  ;;  %v223_v48 = vld [vmem:[%s2736_s28 + $0xa0] sm:$0xff]  ;;  %v294_v18 = vmul.f32 %v2738_v33, %v222_v7 }
  0x3b   : > { %v365_v50 = vadd.f32 %v2749_v40, %v296_v34  ;;  %v295_v53 = vmul.f32 %v2745_v37, %v223_v48  ;;  %v360_v2 = vadd.f32 %v2753_v43, %v291_v52 }
  0x3c   : > { %v571_v5 = vsel %vm554_vm1, %v476_v62, %v538_v56  ;;  %v570_v10 = vsel %vm552_vm0, %v476_v62, %v538_v56  ;;  %v573_v20 = vsel %vm557_vm2, %v476_v62, %v538_v56  ;;  %v575_v21 = vsel %vm560_vm3, %v538_v56, %v476_v62 }
  0x3d   : > { %v2797_v41 = vld.sshfl [vmem:[#allocation1] sm:$0xff pattern:$0x73625140]  ;;  %v2799_v42 = vld.sshfl [vmem:[#allocation1 + $0x8] sm:$0xff pattern:$0x73625140]  ;;  %v364_v3 = vadd.f32 %v2753_v43, %v295_v53 }
  0x3e   : > { %681 = vst [vmem:[#allocation1] ss:$4 sm:$0xff] %v563_v38  ;;  %v572_v11 = vrot.slane %v571_v5, 2  ;;  %v574_v29 = vrot.slane %v573_v20, 4  ;;  %v576_v31 = vrot.slane %v575_v21, 6  ;;  %v478_v38 = vadd.f32 %v422_v28, %v418_v27 }
  0x3f   : > { %v2801_v44 = vld.sshfl [vmem:[#allocation1 + $0x20] sm:$0xff pattern:$0x73625140]  ;;  %v2805_v47 = vld.sshfl [vmem:[#allocation1 + $0x28] sm:$0xff pattern:$0x73625140]  ;;  %v298_v20 = vmul.f32 %v2738_v33, %v226_v8 }
  0x40   : > { %684 = vst [vmem:[#allocation1 + $0x20] ss:$4 sm:$0xff] %v565_v39  ;;  %v578_v51 = vsel %vm554_vm1, %v478_v38, %v539_v30  ;;  %v577_v56 = vsel %vm552_vm0, %v478_v38, %v539_v30  ;;  %v580_v5 = vsel %vm557_vm2, %v478_v38, %v539_v30  ;;  %v582_v6 = vsel %vm560_vm3, %v539_v30, %v478_v38  ;;  %v225_v30 = vld [vmem:[%s2736_s28 + $0xb0] sm:$0xff] }
  0x41   : > { %v424_v9 = vmax.f32 %v360_v2, 0.0  ;;  %v583_v17 = vrot.slane %v582_v6, 6  ;;  %v367_v32 = vadd.f32 %v2749_v40, %v298_v20  ;;  %v297_v46 = vmul.f32 %v2745_v37, %v225_v30  ;;  %v232_v6 = vld [vmem:[%s2736_s28 + $0xe8] sm:$0xff] }
  0x43   : > { %v431_v49 = vmax.f32 %v367_v32, 0.0  ;;  %v231_v32 = vld [vmem:[%s2736_s28 + $0xe0] sm:$0xff] }
  0x45   : > { %v2813_v60 = vld.sshfl [vmem:[#allocation1] sm:$0xff pattern:$0x73625140]  ;;  %v2815_v61 = vld.sshfl [vmem:[#allocation1 + $0x8] sm:$0xff pattern:$0x73625140] }
  0x46   : > { %687 = vst [vmem:[#allocation1] ss:$4 sm:$0xff] %v567_v55  ;;  %v429_v55 = vmax.f32 %v365_v50, 0.0 }
  0x47   : > { %v2817_v63 = vld.sshfl [vmem:[#allocation1 + $0x20] sm:$0xff pattern:$0x73625140]  ;;  %v2819_v0 = vld.sshfl [vmem:[#allocation1 + $0x28] sm:$0xff pattern:$0x73625140] }
  0x48   : > { %690 = vst [vmem:[#allocation1 + $0x20] ss:$4 sm:$0xff] %v569_v57  ;;  %v579_v57 = vrot.slane %v578_v51, 2  ;;  %v481_v4 = vadd.f32 %v429_v55, %v425_v54 }
  0x4a   : > { %v540_v16 = vrot.slane %v481_v4, 6 }
  0x4d   : > { %v2829_v12 = vld.sshfl [vmem:[#allocation1] sm:$0xff pattern:$0x73625140]  ;;  %v2831_v13 = vld.sshfl [vmem:[#allocation1 + $0x8] sm:$0xff pattern:$0x73625140] }
  0x4e   : > { %693 = vst [vmem:[#allocation1] ss:$4 sm:$0xff] %v570_v10  ;;  %v428_v10 = vmax.f32 %v364_v3, 0.0 }
  0x4f   : > { %v2833_v14 = vld.sshfl [vmem:[#allocation1 + $0x20] sm:$0xff pattern:$0x73625140]  ;;  %v2835_v15 = vld.sshfl [vmem:[#allocation1 + $0x28] sm:$0xff pattern:$0x73625140] }
  0x50   : > { %696 = vst [vmem:[#allocation1 + $0x20] ss:$4 sm:$0xff] %v572_v11  ;;  %v581_v11 = vrot.slane %v580_v5, 4  ;;  %v480_v24 = vadd.f32 %v428_v10, %v424_v9  ;;  %v228_v5 = vld [vmem:[%s2736_s28 + $0xc8] sm:$0xff] }
  0x52   : > { %v585_v34 = vsel %vm554_vm1, %v480_v24, %v540_v16  ;;  %v584_v50 = vsel %vm552_vm0, %v480_v24, %v540_v16  ;;  %v587_v3 = vsel %vm557_vm2, %v480_v24, %v540_v16  ;;  %v589_v4 = vsel %vm560_vm3, %v540_v16, %v480_v24  ;;  %v227_v24 = vld [vmem:[%s2736_s28 + $0xc0] sm:$0xff] }
  0x53   : > { %v586_v51 = vrot.slane %v585_v34, 2  ;;  %v588_v9 = vrot.slane %v587_v3, 4 }
  0x55   : > { %v2845_v35 = vld.sshfl [vmem:[#allocation1] sm:$0xff pattern:$0x73625140]  ;;  %v2847_v36 = vld.sshfl [vmem:[#allocation1 + $0x8] sm:$0xff pattern:$0x73625140] }
  0x56   : > { %3902 = vst [vmem:[#allocation5_spill] sm:$0xff] %v2845_v35 }
  0x57   : > { %3903 = vst [vmem:[#allocation6_spill] sm:$0xff] %v2847_v36  ;;  %v2849_v39 = vld.sshfl [vmem:[#allocation1 + $0x20] sm:$0xff pattern:$0x73625140] }
  0x58   : > { %3904 = vst [vmem:[#allocation7_spill] sm:$0xff] %v2849_v39  ;;  %v2851_v45 = vld.sshfl [vmem:[#allocation1 + $0x28] sm:$0xff pattern:$0x73625140] }
  0x59   : > { %3905 = vst [vmem:[#allocation8_spill] sm:$0xff] %v2851_v45 }
  0x5a   : > { %699 = vst [vmem:[#allocation1] ss:$4 sm:$0xff] %v574_v29  ;;  %v221_v29 = vld [vmem:[%s2736_s28 + $0x90] sm:$0xff] }
  0x5b   : > { %702 = vst [vmem:[#allocation1 + $0x20] ss:$4 sm:$0xff] %v576_v31  ;;  %v363_v31 = vadd.f32 %v2749_v40, %v294_v18  ;;  %v293_v38 = vmul.f32 %v2745_v37, %v221_v29  ;;  %v304_v18 = vmul.f32 %v2738_v33, %v232_v6 }
  0x5d   : > { %v427_v48 = vmax.f32 %v363_v31, 0.0 }
  0x5f   : > { %v483_v2 = vadd.f32 %v431_v49, %v427_v48  ;;  %v299_v48 = vmul.f32 %v2745_v37, %v227_v24  ;;  %v303_v49 = vmul.f32 %v2745_v37, %v231_v32 }
  0x61   : > { %v2861_v58 = vld.sshfl [vmem:[#allocation1] sm:$0xff pattern:$0x73625140]  ;;  %v2863_v59 = vld.sshfl [vmem:[#allocation1 + $0x8] sm:$0xff pattern:$0x73625140]  ;;  %v368_v6 = vadd.f32 %v2753_v43, %v299_v48 }
  0x62   : > { %3906 = vst [vmem:[#allocation9_spill] sm:$0xff] %v2861_v58  ;;  %v2865_v62 = vld.sshfl [vmem:[#allocation1 + $0x20] sm:$0xff pattern:$0x73625140]  ;;  %v541_v10 = vrot.slane %v483_v2, 6 }
  0x63   : > { %3907 = vst [vmem:[#allocation10_spill] sm:$0xff] %v2863_v59  ;;  %v2867_v1 = vld.sshfl [vmem:[#allocation1 + $0x28] sm:$0xff pattern:$0x73625140]  ;;  %v432_v24 = vmax.f32 %v368_v6, 0.0  ;;  %v233_v6 = vld [vmem:[%s2736_s28 + $0xf0] sm:$0xff] }
  0x64   : > { %3908 = vst [vmem:[#allocation11_spill] sm:$0xff] %v2865_v62  ;;  %v266_v62 = vld [vmem:[%s2736_s28 + $0x1f8] sm:$0xff] }
  0x65   : > { %3909 = vst [vmem:[#allocation12_spill] sm:$0xff] %v2867_v1 }
  0x66   : > { %705 = vst [vmem:[#allocation1] ss:$4 sm:$0xff] %v577_v56  ;;  %v362_v56 = vadd.f32 %v2753_v43, %v293_v38  ;;  %v373_v38 = vadd.f32 %v2749_v40, %v304_v18  ;;  %v234_v18 = vld [vmem:[%s2736_s28 + $0xf8] sm:$0xff] }
  0x67   : > { %708 = vst [vmem:[#allocation1 + $0x20] ss:$4 sm:$0xff] %v579_v57  ;;  %v366_v57 = vadd.f32 %v2753_v43, %v297_v46 }
  0x68   : > { %v426_v7 = vmax.f32 %v362_v56, 0.0 }
  0x69   : > { %v430_v8 = vmax.f32 %v366_v57, 0.0 }
  0x6b   : > { %v482_v30 = vadd.f32 %v430_v8, %v426_v7  ;;  %v372_v7 = vadd.f32 %v2753_v43, %v303_v49  ;;  %v306_v49 = vmul.f32 %v2738_v33, %v234_v18  ;;  %v305_v18 = vmul.f32 %v2745_v37, %v233_v6 }
  0x6d   : > { %v2877_v21 = vld.sshfl [vmem:[#allocation1] sm:$0xff pattern:$0x73625140]  ;;  %v2879_v23 = vld.sshfl [vmem:[#allocation1 + $0x8] sm:$0xff pattern:$0x73625140]  ;;  %v592_v46 = vsel %vm554_vm1, %v482_v30, %v541_v10  ;;  %v591_v56 = vsel %vm552_vm0, %v482_v30, %v541_v10 }
  0x6e   : > { %3910 = vst [vmem:[#allocation13_spill] sm:$0xff] %v2877_v21  ;;  %v2881_v27 = vld.sshfl [vmem:[#allocation1 + $0x20] sm:$0xff pattern:$0x73625140]  ;;  %v593_v57 = vrot.slane %v592_v46, 2  ;;  %v436_v32 = vmax.f32 %v372_v7, 0.0 }
  0x6f   : > { %3911 = vst [vmem:[#allocation14_spill] sm:$0xff] %v2879_v23  ;;  %v2883_v28 = vld.sshfl [vmem:[#allocation1 + $0x28] sm:$0xff pattern:$0x73625140]  ;;  %v265_v21 = vld [vmem:[%s2736_s28 + $0x1f0] sm:$0xff] }
  0x70   : > { %3912 = vst [vmem:[#allocation15_spill] sm:$0xff] %v2881_v27  ;;  %v264_v27 = vld [vmem:[%s2736_s28 + $0x1e8] sm:$0xff] }
  0x71   : > { %3913 = vst [vmem:[#allocation16_spill] sm:$0xff] %v2883_v28 }
  0x72   : > { %711 = vst [vmem:[#allocation1] ss:$4 sm:$0xff] %v581_v11  ;;  %v590_v11 = vrot.slane %v589_v4, 6 }
  0x73   : > { %714 = vst [vmem:[#allocation1 + $0x20] ss:$4 sm:$0xff] %v583_v17  ;;  %v300_v17 = vmul.f32 %v2738_v33, %v228_v5 }
  0x75   : > { %v369_v34 = vadd.f32 %v2749_v40, %v300_v17  ;;  %v230_v17 = vld [vmem:[%s2736_s28 + $0xd8] sm:$0xff] }
  0x76   : > { %v302_v48 = vmul.f32 %v2738_v33, %v230_v17 }
  0x78   : > { %v371_v7 = vadd.f32 %v2749_v40, %v302_v48 }
  0x79   : > { %v2893_v52 = vld.sshfl [vmem:[#allocation1] sm:$0xff pattern:$0x73625140]  ;;  %v2895_v53 = vld.sshfl [vmem:[#allocation1 + $0x8] sm:$0xff pattern:$0x73625140] }
  0x7a   : > { %3914 = vst [vmem:[#allocation17_spill] sm:$0xff] %v2893_v52  ;;  %v2897_v54 = vld.sshfl [vmem:[#allocation1 + $0x20] sm:$0xff pattern:$0x73625140] }
  0x7b   : > { %3915 = vst [vmem:[#allocation18_spill] sm:$0xff] %v2895_v53  ;;  %v2899_v55 = vld.sshfl [vmem:[#allocation1 + $0x28] sm:$0xff pattern:$0x73625140]  ;;  %v255_v53 = vld [vmem:[%s2736_s28 + $0x1a0] sm:$0xff] }
  0x7c   : > { %3916 = vst [vmem:[#allocation19_spill] sm:$0xff] %v2897_v54  ;;  %v261_v54 = vld [vmem:[%s2736_s28 + $0x1d0] sm:$0xff]  ;;  %v263_v52 = vld [vmem:[%s2736_s28 + $0x1e0] sm:$0xff] }
  0x7d   : > { %3917 = vst [vmem:[#allocation20_spill] sm:$0xff] %v2899_v55 }
  0x7e   : > { %717 = vst [vmem:[#allocation1] ss:$4 sm:$0xff] %v584_v50  ;;  %v433_v50 = vmax.f32 %v369_v34, 0.0 }
  0x7f   : > { %720 = vst [vmem:[#allocation1 + $0x20] ss:$4 sm:$0xff] %v586_v51  ;;  %v437_v51 = vmax.f32 %v373_v38, 0.0 }
  0x81   : > { %v485_v8 = vadd.f32 %v437_v51, %v433_v50 }
  0x83   : > { %v542_v38 = vrot.slane %v485_v8, 6  ;;  %v375_v8 = vadd.f32 %v2749_v40, %v306_v49 }
  0x85   : > { %v2909_v20 = vld.sshfl [vmem:[#allocation1] sm:$0xff pattern:$0x73625140]  ;;  %v2911_v29 = vld.sshfl [vmem:[#allocation1 + $0x8] sm:$0xff pattern:$0x73625140] }
  0x86   : > { %3918 = vst [vmem:[#allocation21_spill] sm:$0xff] %v2909_v20  ;;  %v2913_v31 = vld.sshfl [vmem:[#allocation1 + $0x20] sm:$0xff pattern:$0x73625140] }
  0x87   : > { %3919 = vst [vmem:[#allocation22_spill] sm:$0xff] %v2911_v29  ;;  %v2915_v16 = vld.sshfl [vmem:[#allocation1 + $0x28] sm:$0xff pattern:$0x73625140]  ;;  %v245_v29 = vld [vmem:[%s2736_s28 + $0x150] sm:$0xff] }
  0x88   : > { %3920 = vst [vmem:[#allocation23_spill] sm:$0xff] %v2913_v31  ;;  %v253_v31 = vld [vmem:[%s2736_s28 + $0x190] sm:$0xff]  ;;  %v317_v59 = vmul.f32 %v2745_v37, %v245_v29 }
  0x89   : > { %3921 = vst [vmem:[#allocation24_spill] sm:$0xff] %v2915_v16 }
  0x8a   : > { %723 = vst [vmem:[#allocation1] ss:$4 sm:$0xff] %v588_v9  ;;  %v594_v9 = vsel %vm557_vm2, %v482_v30, %v541_v10 }
  0x8b   : > { %726 = vst [vmem:[#allocation1 + $0x20] ss:$4 sm:$0xff] %v590_v11  ;;  %v596_v11 = vsel %vm560_vm3, %v541_v10, %v482_v30  ;;  %v595_v34 = vrot.slane %v594_v9, 4  ;;  %v484_v10 = vadd.f32 %v436_v32, %v432_v24  ;;  %v236_v24 = vld [vmem:[%s2736_s28 + $0x108] sm:$0xff]  ;;  %v237_v32 = vld [vmem:[%s2736_s28 + $0x110] sm:$0xff] }
  0x8c   : > { %v597_v46 = vrot.slane %v596_v11, 6  ;;  %v235_v11 = vld [vmem:[%s2736_s28 + $0x100] sm:$0xff]  ;;  %v309_v20 = vmul.f32 %v2745_v37, %v237_v32 }
  0x8d   : > { %v599_v9 = vsel %vm554_vm1, %v484_v10, %v542_v38  ;;  %v598_v48 = vsel %vm552_vm0, %v484_v10, %v542_v38  ;;  %v601_v55 = vsel %vm557_vm2, %v484_v10, %v542_v38  ;;  %v603_v32 = vsel %vm560_vm3, %v542_v38, %v484_v10 }
  0x8e   : > { %v600_v49 = vrot.slane %v599_v9, 2  ;;  %v602_v10 = vrot.slane %v601_v55, 4 }
  0x91   : > { %v2925_v2 = vld.sshfl [vmem:[#allocation1] sm:$0xff pattern:$0x73625140]  ;;  %v2927_v3 = vld.sshfl [vmem:[#allocation1 + $0x8] sm:$0xff pattern:$0x73625140] }
  0x92   : > { %3922 = vst [vmem:[#allocation25_spill] sm:$0xff] %v2925_v2  ;;  %v2929_v4 = vld.sshfl [vmem:[#allocation1 + $0x20] sm:$0xff pattern:$0x73625140]  ;;  %v307_v2 = vmul.f32 %v2745_v37, %v235_v11  ;;  %v256_v11 = vld [vmem:[%s2736_s28 + $0x1a8] sm:$0xff] }
  0x93   : > { %3923 = vst [vmem:[#allocation26_spill] sm:$0xff] %v2927_v3  ;;  %v2931_v5 = vld.sshfl [vmem:[#allocation1 + $0x28] sm:$0xff pattern:$0x73625140]  ;;  %v241_v3 = vld [vmem:[%s2736_s28 + $0x130] sm:$0xff] }
  0x94   : > { %3924 = vst [vmem:[#allocation27_spill] sm:$0xff] %v2929_v4  ;;  %v250_v4 = vld [vmem:[%s2736_s28 + $0x178] sm:$0xff]  ;;  %v313_v23 = vmul.f32 %v2745_v37, %v241_v3 }
  0x95   : > { %3925 = vst [vmem:[#allocation28_spill] sm:$0xff] %v2931_v5  ;;  %v240_v5 = vld [vmem:[%s2736_s28 + $0x128] sm:$0xff]  ;;  %v322_v38 = vmul.f32 %v2738_v33, %v250_v4 }
  0x96   : > { %729 = vst [vmem:[#allocation1] ss:$4 sm:$0xff] %v591_v56  ;;  %v312_v28 = vmul.f32 %v2738_v33, %v240_v5 }
  0x97   : > { %732 = vst [vmem:[#allocation1 + $0x20] ss:$4 sm:$0xff] %v593_v57  ;;  %v229_v57 = vld [vmem:[%s2736_s28 + $0xd0] sm:$0xff] }
  0x98   : > { %v301_v17 = vmul.f32 %v2745_v37, %v229_v57 }
  0x9a   : > { %v370_v9 = vadd.f32 %v2753_v43, %v301_v17  ;;  %v254_v17 = vld [vmem:[%s2736_s28 + $0x198] sm:$0xff] }
  0x9b   : > { %v326_v39 = vmul.f32 %v2738_v33, %v254_v17  ;;  %v333_v17 = vmul.f32 %v2745_v37, %v261_v54  ;;  %v3046_v54 = vadd.f32 %v2753_v43, %v309_v20  ;;  %v3063_v20 = vadd.f32 %v2753_v43, %v317_v59 }
  0x9c   : > { %v434_v45 = vmax.f32 %v370_v9, 0.0  ;;  %v325_v9 = vmul.f32 %v2745_v37, %v253_v31 }
  0x9d   : > { %v2941_v50 = vld.sshfl [vmem:[#allocation1] sm:$0xff pattern:$0x73625140]  ;;  %v2943_v51 = vld.sshfl [vmem:[#allocation1 + $0x8] sm:$0xff pattern:$0x73625140] }
  0x9e   : > { %3926 = vst [vmem:[#allocation29_spill] sm:$0xff] %v2941_v50  ;;  %v2945_v30 = vld.sshfl [vmem:[#allocation1 + $0x20] sm:$0xff pattern:$0x73625140]  ;;  %v374_v50 = vadd.f32 %v2753_v43, %v305_v18 }
  0x9f   : > { %3927 = vst [vmem:[#allocation30_spill] sm:$0xff] %v2943_v51  ;;  %v2947_v56 = vld.sshfl [vmem:[#allocation1 + $0x28] sm:$0xff pattern:$0x73625140]  ;;  %v239_v51 = vld [vmem:[%s2736_s28 + $0x120] sm:$0xff] }
  0xa0   : > { %3928 = vst [vmem:[#allocation31_spill] sm:$0xff] %v2945_v30  ;;  %v246_v30 = vld [vmem:[%s2736_s28 + $0x158] sm:$0xff]  ;;  %v438_v36 = vmax.f32 %v374_v50, 0.0  ;;  %v604_v50 = vrot.slane %v603_v32, 6 }
  0xa1   : > { %3929 = vst [vmem:[#allocation32_spill] sm:$0xff] %v2947_v56  ;;  %v439_v56 = vmax.f32 %v375_v8, 0.0  ;;  %v242_v8 = vld [vmem:[%s2736_s28 + $0x138] sm:$0xff]  ;;  %v318_v5 = vmul.f32 %v2738_v33, %v246_v30  ;;  %v327_v30 = vmul.f32 %v2745_v37, %v255_v53 }
  0xa2   : > { %735 = vst [vmem:[#allocation1] ss:$4 sm:$0xff] %v595_v34  ;;  %v238_v34 = vld [vmem:[%s2736_s28 + $0x118] sm:$0xff]  ;;  %v314_v1 = vmul.f32 %v2738_v33, %v242_v8 }
  0xa3   : > { %738 = vst [vmem:[#allocation1 + $0x20] ss:$4 sm:$0xff] %v597_v46  ;;  %v435_v46 = vmax.f32 %v371_v7, 0.0  ;;  %v310_v18 = vmul.f32 %v2738_v33, %v238_v34  ;;  %v258_v34 = vld [vmem:[%s2736_s28 + $0x1b8] sm:$0xff] }
  0xa9   : > { %v2964_v57 = vld.sshfl [vmem:[#allocation1] sm:$0xff pattern:$0x73625140]  ;;  %v2966_v6 = vld.sshfl [vmem:[#allocation1 + $0x8] sm:$0xff pattern:$0x73625140] }
  0xaa   : > { %3930 = vst [vmem:[#allocation33_spill] sm:$0xff] %v2964_v57  ;;  %v2968_v16 = vld.sshfl [vmem:[#allocation1 + $0x20] sm:$0xff pattern:$0x73625140]  ;;  %v249_v57 = vld [vmem:[%s2736_s28 + $0x170] sm:$0xff] }
  0xab   : > { %3931 = vst [vmem:[#allocation34_spill] sm:$0xff] %v2966_v6  ;;  %v2970_v7 = vld.sshfl [vmem:[#allocation1 + $0x28] sm:$0xff pattern:$0x73625140]  ;;  %v251_v6 = vld [vmem:[%s2736_s28 + $0x180] sm:$0xff]  ;;  %v321_v3 = vmul.f32 %v2745_v37, %v249_v57  ;;  %v328_v57 = vmul.f32 %v2738_v33, %v256_v11 }
  0xac   : > { %3932 = vst [vmem:[#allocation35_spill] sm:$0xff] %v2968_v16  ;;  %v308_v16 = vmul.f32 %v2738_v33, %v236_v24  ;;  %v257_v24 = vld [vmem:[%s2736_s28 + $0x1b0] sm:$0xff]  ;;  %v323_v58 = vmul.f32 %v2745_v37, %v251_v6  ;;  %v330_v6 = vmul.f32 %v2738_v33, %v258_v34  ;;  %v3038_v34 = vmul.f32 %v2745_v37, %v265_v21 }
  0xad   : > { %3933 = vst [vmem:[#allocation36_spill] sm:$0xff] %v2970_v7  ;;  %v252_v7 = vld [vmem:[%s2736_s28 + $0x188] sm:$0xff]  ;;  %v329_v35 = vmul.f32 %v2745_v37, %v257_v24  ;;  %v336_v24 = vmul.f32 %v2738_v33, %v264_v27  ;;  %v3056_v21 = vadd.f32 %v2753_v43, %v313_v23 }
  0xae   : > { %741 = vst [vmem:[#allocation1] ss:$4 sm:$0xff] %v598_v48  ;;  %v487_v48 = vadd.f32 %v439_v56, %v435_v46  ;;  %v259_v56 = vld [vmem:[%s2736_s28 + $0x1c0] sm:$0xff]  ;;  %v260_v46 = vld [vmem:[%s2736_s28 + $0x1c8] sm:$0xff]  ;;  %v324_v8 = vmul.f32 %v2738_v33, %v252_v7  ;;  %v3073_v23 = vadd.f32 %v2753_v43, %v323_v58  ;;  %v397_v58 = vadd.f32 %v2749_v40, %v328_v57 }
  0xaf   : > { %744 = vst [vmem:[#allocation1 + $0x20] ss:$4 sm:$0xff] %v600_v49  ;;  %v311_v49 = vmul.f32 %v2745_v37, %v239_v51  ;;  %v262_v51 = vld [vmem:[%s2736_s28 + $0x1d8] sm:$0xff]  ;;  %v331_v7 = vmul.f32 %v2745_v37, %v259_v56  ;;  %v332_v53 = vmul.f32 %v2738_v33, %v260_v46  ;;  %v377_v56 = vadd.f32 %v2749_v40, %v308_v16 }
  0xb0   : > { %v3011_v29 = vrot.slane %v487_v48, 6  ;;  %v3024_v48 = vadd.f32 %v438_v36, %v434_v45  ;;  %v334_v11 = vmul.f32 %v2738_v33, %v262_v51  ;;  %v338_v36 = vmul.f32 %v2738_v33, %v266_v62 }
  0xb1   : > { %v3042_v45 = vadd.f32 %v2753_v43, %v307_v2  ;;  %v381_v46 = vadd.f32 %v2749_v40, %v312_v28  ;;  %v3053_v27 = vadd.f32 %v2753_v43, %v311_v49  ;;  %v383_v62 = vadd.f32 %v2749_v40, %v314_v1 }
  0xb2   : > { %v606_v16 = vsel %vm554_vm1, %v3024_v48, %v3011_v29  ;;  %v3066_v2 = vadd.f32 %v2749_v40, %v318_v5  ;;  %v3069_v28 = vadd.f32 %v2753_v43, %v321_v3  ;;  %v393_v1 = vadd.f32 %v2749_v40, %v324_v8 }
  0xb3   : > { %v3077_v49 = vadd.f32 %v2753_v43, %v325_v9  ;;  %v3080_v51 = vadd.f32 %v2749_v40, %v326_v39  ;;  %v441_v59 = vmax.f32 %v377_v56, 0.0  ;;  %v605_v5 = vsel %vm552_vm0, %v3024_v48, %v3011_v29 }
  0xb4   : > { %v607_v3 = vrot.slane %v606_v16, 2  ;;  %v3090_v8 = vadd.f32 %v2753_v43, %v329_v35  ;;  %v3098_v56 = vadd.f32 %v2753_v43, %v331_v7  ;;  %v3102_v16 = vadd.f32 %v2753_v43, %v333_v17 }
  0xb5   : > { %v3017_v4 = vld.sshfl [vmem:[#allocation1] sm:$0xff pattern:$0x73625140]  ;;  %v3019_v55 = vld.sshfl [vmem:[#allocation1 + $0x8] sm:$0xff pattern:$0x73625140] }
  0xb6   : > { %3934 = vst [vmem:[#allocation37_spill] sm:$0xff] %v3017_v4  ;;  %v3026_v32 = vld.sshfl [vmem:[#allocation1 + $0x20] sm:$0xff pattern:$0x73625140]  ;;  %v442_v7 = vmax.f32 %v3046_v54, 0.0  ;;  %v444_v17 = vmax.f32 %v3053_v27, 0.0  ;;  %v610_v27 = vsel %vm560_vm3, %v3011_v29, %v3024_v48 }
  0xb7   : > { %3935 = vst [vmem:[#allocation38_spill] sm:$0xff] %v3019_v55  ;;  %v3028_v31 = vld.sshfl [vmem:[#allocation1 + $0x28] sm:$0xff pattern:$0x73625140]  ;;  %v3034_v55 = vmul.f32 %v2745_v37, %v263_v52  ;;  %v3049_v52 = vadd.f32 %v2749_v40, %v310_v18  ;;  %v391_v18 = vadd.f32 %v2749_v40, %v322_v38  ;;  %v3086_v38 = vadd.f32 %v2753_v43, %v327_v30 }
  0xb8   : > { %3936 = vst [vmem:[#allocation39_spill] sm:$0xff] %v3026_v32  ;;  %v403_v30 = vadd.f32 %v2749_v40, %v334_v11  ;;  %v447_v11 = vmax.f32 %v383_v62, 0.0  ;;  %v458_v62 = vmax.f32 %v3077_v49, 0.0 }
  0xb9   : > { %3937 = vst [vmem:[#allocation40_spill] sm:$0xff] %v3028_v31  ;;  %v407_v31 = vadd.f32 %v2749_v40, %v338_v36  ;;  %v608_v36 = vsel %vm557_vm2, %v3024_v48, %v3011_v29  ;;  %v455_v54 = vmax.f32 %v391_v18, 0.0  ;;  %v611_v18 = vrot.slane %v610_v27, 6 }
  0xba   : > { %747 = vst [vmem:[#allocation1] ss:$4 sm:$0xff] %v602_v10  ;;  %v445_v10 = vmax.f32 %v381_v46, 0.0  ;;  %v401_v46 = vadd.f32 %v2749_v40, %v332_v53  ;;  %v443_v53 = vmax.f32 %v3049_v52, 0.0  ;;  %v456_v52 = vmax.f32 %v3073_v23, 0.0 }
  0xbb   : > { %750 = vst [vmem:[#allocation1 + $0x20] ss:$4 sm:$0xff] %v604_v50  ;;  %v399_v50 = vadd.f32 %v2749_v40, %v330_v6  ;;  %v405_v6 = vadd.f32 %v2749_v40, %v336_v24  ;;  %v471_v4 = vmax.f32 %v407_v31, 0.0  ;;  %v404_v23 = vadd.f32 %v2753_v43, %v3034_v55 }
  0xbc   : > { %v489_v24 = vadd.f32 %v445_v10, %v441_v59  ;;  %v465_v10 = vmax.f32 %v401_v46, 0.0  ;;  %v3132_v29 = vadd.f32 %v2753_v43, %v3038_v34  ;;  %v462_v55 = vmax.f32 %v3090_v8, 0.0 }
  0xbd   : > { %v463_v59 = vmax.f32 %v399_v50, 0.0  ;;  %v469_v32 = vmax.f32 %v405_v6, 0.0  ;;  %v460_v50 = vmax.f32 %v3086_v38, 0.0  ;;  %v464_v34 = vmax.f32 %v3098_v56, 0.0 }
  0xbe   : > { %v466_v6 = vmax.f32 %v3102_v16, 0.0 }
  0xc1   : > { %v3093_v9 = vld.sshfl [vmem:[#allocation1] sm:$0xff pattern:$0x73625140]  ;;  %v3095_v39 = vld.sshfl [vmem:[#allocation1 + $0x8] sm:$0xff pattern:$0x73625140] }
  0xc2   : > { %3938 = vst [vmem:[#allocation41_spill] sm:$0xff] %v3093_v9  ;;  %v3105_v57 = vld.sshfl [vmem:[#allocation1 + $0x20] sm:$0xff pattern:$0x73625140]  ;;  %v446_v9 = vmax.f32 %v3056_v21, 0.0  ;;  %v457_v21 = vmax.f32 %v393_v1, 0.0 }
  0xc3   : > { %3939 = vst [vmem:[#allocation42_spill] sm:$0xff] %v3095_v39  ;;  %v3107_v35 = vld.sshfl [vmem:[#allocation1 + $0x28] sm:$0xff pattern:$0x73625140]  ;;  %v440_v39 = vmax.f32 %v3042_v45, 0.0  ;;  %v454_v45 = vmax.f32 %v3069_v28, 0.0 }
  0xc4   : > { %3940 = vst [vmem:[#allocation43_spill] sm:$0xff] %v3105_v57  ;;  %v450_v57 = vmax.f32 %v3063_v20, 0.0  ;;  %v459_v20 = vmax.f32 %v3080_v51, 0.0  ;;  %v544_v28 = vrot.slane %v489_v24, 6  ;;  %v491_v51 = vadd.f32 %v447_v11, %v443_v53  ;;  %v244_v53 = vld [vmem:[%s2736_s28 + $0x148] sm:$0xff] }
  0xc5   : > { %3941 = vst [vmem:[#allocation44_spill] sm:$0xff] %v3107_v35  ;;  %v451_v35 = vmax.f32 %v3066_v2, 0.0  ;;  %v461_v2 = vmax.f32 %v397_v58, 0.0  ;;  %v488_v49 = vadd.f32 %v444_v17, %v440_v39  ;;  %v501_v39 = vadd.f32 %v469_v32, %v465_v10  ;;  %v248_v17 = vld [vmem:[%s2736_s28 + $0x168] sm:$0xff] }
  0xc6   : > { %753 = vst [vmem:[#allocation1] ss:$4 sm:$0xff] %v605_v5  ;;  %v467_v5 = vmax.f32 %v403_v30, 0.0  ;;  %v499_v24 = vadd.f32 %v463_v59, %v459_v20  ;;  %v468_v11 = vmax.f32 %v404_v23, 0.0  ;;  %v316_v38 = vmul.f32 %v2738_v33, %v244_v53 }
  0xc7   : > { %756 = vst [vmem:[#allocation1 + $0x20] ss:$4 sm:$0xff] %v607_v3  ;;  %v609_v3 = vrot.slane %v608_v36, 4  ;;  %v495_v46 = vadd.f32 %v455_v54, %v451_v35  ;;  %v497_v30 = vadd.f32 %v461_v2, %v457_v21  ;;  %v470_v36 = vmax.f32 %v3132_v29, 0.0  ;;  %v243_v21 = vld [vmem:[%s2736_s28 + $0x140] sm:$0xff] }
  0xc8   : > { %v320_v8 = vmul.f32 %v2738_v33, %v248_v17  ;;  %v490_v35 = vadd.f32 %v446_v9, %v442_v7  ;;  %v503_v54 = vadd.f32 %v471_v4, %v467_v5  ;;  %v545_v27 = vrot.slane %v491_v51, 6  ;;  %v247_v2 = vld [vmem:[%s2736_s28 + $0x160] sm:$0xff] }
  0xc9   : > { %v613_v56 = vsel %vm554_vm1, %v488_v49, %v544_v28  ;;  %v3156_v32 = vrot.slane %v497_v30, 6  ;;  %v385_v20 = vadd.f32 %v2749_v40, %v316_v38  ;;  %v3160_v10 = vrot.slane %v499_v24, 6 }
  0xca   : > { %v389_v59 = vadd.f32 %v2749_v40, %v320_v8  ;;  %v315_v33 = vmul.f32 %v2745_v37, %v243_v21  ;;  %v319_v4 = vmul.f32 %v2745_v37, %v247_v2  ;;  %v612_v9 = vsel %vm552_vm0, %v488_v49, %v544_v28 }
  0xcb   : > { %v614_v7 = vrot.slane %v613_v56, 2  ;;  %v449_v5 = vmax.f32 %v385_v20, 0.0  ;;  %v3167_v29 = vadd.f32 %v454_v45, %v450_v57  ;;  %v615_v51 = vsel %vm557_vm2, %v488_v49, %v544_v28 }
  0xcc   : > { %v453_v23 = vmax.f32 %v389_v59, 0.0  ;;  %v3174_v30 = vadd.f32 %v460_v50, %v456_v52  ;;  %v3176_v24 = vadd.f32 %v462_v55, %v458_v62  ;;  %v3184_v17 = vrot.slane %v503_v54, 6 }
  0xcd   : > { %v3134_v48 = vld.sshfl [vmem:[#allocation1] sm:$0xff pattern:$0x73625140]  ;;  %v3136_v1 = vld.sshfl [vmem:[#allocation1 + $0x8] sm:$0xff pattern:$0x73625140]  ;;  %v617_v57 = vsel %vm560_vm3, %v544_v28, %v488_v49  ;;  %v384_v45 = vadd.f32 %v2753_v43, %v315_v33  ;;  %v388_v38 = vadd.f32 %v2753_v43, %v319_v4  ;;  %v3190_v52 = vsel %vm554_vm1, %v490_v35, %v545_v27 }
  0xce   : > { %3942 = vst [vmem:[#allocation45_spill] sm:$0xff] %v3134_v48  ;;  %v3138_v58 = vld.sshfl [vmem:[#allocation1 + $0x20] sm:$0xff pattern:$0x73625140]  ;;  %v616_v8 = vrot.slane %v615_v51, 4  ;;  %v3193_v62 = vsel %vm557_vm2, %v490_v35, %v545_v27  ;;  %v3196_v50 = vsel %vm560_vm3, %v545_v27, %v490_v35  ;;  %v493_v55 = vadd.f32 %v453_v23, %v449_v5 }
  0xcf   : > { %3943 = vst [vmem:[#allocation46_spill] sm:$0xff] %v3136_v1  ;;  %v3140_v31 = vld.sshfl [vmem:[#allocation1 + $0x28] sm:$0xff pattern:$0x73625140]  ;;  %v3221_v54 = vsel %vm557_vm2, %v3174_v30, %v3156_v32  ;;  %v3226_v56 = vsel %vm560_vm3, %v3156_v32, %v3174_v30  ;;  %v448_v20 = vmax.f32 %v384_v45, 0.0  ;;  %v452_v59 = vmax.f32 %v388_v38, 0.0 }
  0xd0   : > { %3944 = vst [vmem:[#allocation47_spill] sm:$0xff] %v3138_v58  ;;  %v3241_v45 = vadd.f32 %v470_v36, %v466_v6  ;;  %v619_v4 = vsel %vm552_vm0, %v490_v35, %v545_v27  ;;  %v3249_v23 = vsel %vm554_vm1, %v3176_v24, %v3160_v10  ;;  %v3261_v36 = vsel %vm560_vm3, %v3160_v10, %v3176_v24 }
  0xd1   : > { %3945 = vst [vmem:[#allocation48_spill] sm:$0xff] %v3140_v31  ;;  %v3244_v21 = vadd.f32 %v452_v59, %v448_v20 }
  0xd2   : > { %759 = vst [vmem:[#allocation1] ss:$4 sm:$0xff] %v609_v3  ;;  %v3154_v3 = vrot.slane %v495_v46, 6  ;;  %v3281_v59 = vsel %vm554_vm1, %v3241_v45, %v3184_v17 }
  0xd3   : > { %762 = vst [vmem:[#allocation1 + $0x20] ss:$4 sm:$0xff] %v611_v18  ;;  %v3162_v18 = vrot.slane %v501_v39, 6  ;;  %v3178_v39 = vadd.f32 %v468_v11, %v464_v34  ;;  %v618_v34 = vrot.slane %v617_v57, 6  ;;  %v3216_v11 = vsel %vm554_vm1, %v3174_v30, %v3156_v32 }
  0xd4   : > { %v3201_v28 = vsel %vm554_vm1, %v3167_v29, %v3154_v3  ;;  %v3206_v43 = vsel %vm557_vm2, %v3167_v29, %v3154_v3  ;;  %v3211_v49 = vsel %vm560_vm3, %v3154_v3, %v3167_v29  ;;  %v3237_v57 = vrot.slane %v493_v55, 6  ;;  %3954 = vst [vmem:[#allocation57_spill] sm:$0xff] %v3281_v59 }
  0xd5   : > { %v3254_v55 = vsel %vm557_vm2, %v3176_v24, %v3160_v10  ;;  %v3266_v35 = vsel %vm554_vm1, %v3178_v39, %v3162_v18 }
  0xd6   : > { %3950 = vst [vmem:[#allocation53_spill] sm:$0xff] %v3254_v55 }
  0xd7   : > { %3951 = vst [vmem:[#allocation54_spill] sm:$0xff] %v3266_v35 }
  0xd9   : > { %v3170_v46 = vld.sshfl [vmem:[#allocation1] sm:$0xff pattern:$0x73625140]  ;;  %v3172_v40 = vld.sshfl [vmem:[#allocation1 + $0x8] sm:$0xff pattern:$0x73625140] }
  0xda   : > { %3946 = vst [vmem:[#allocation49_spill] sm:$0xff] %v3170_v46  ;;  %v3180_v37 = vld.sshfl [vmem:[#allocation1 + $0x20] sm:$0xff pattern:$0x73625140]  ;;  %v3316_v46 = vsel %vm560_vm3, %v3237_v57, %v3244_v21 }
  0xdb   : > { %3947 = vst [vmem:[#allocation50_spill] sm:$0xff] %v3172_v40  ;;  %v3182_v53 = vld.sshfl [vmem:[#allocation1 + $0x28] sm:$0xff pattern:$0x73625140] }
  0xdc   : > { %3948 = vst [vmem:[#allocation51_spill] sm:$0xff] %v3180_v37  ;;  %v3311_v37 = vsel %vm557_vm2, %v3244_v21, %v3237_v57 }
  0xdd   : > { %3949 = vst [vmem:[#allocation52_spill] sm:$0xff] %v3182_v53 }
  0xde   : > { %765 = vst [vmem:[#allocation1] ss:$4 sm:$0xff] %v612_v9 }
  0xdf   : > { %768 = vst [vmem:[#allocation1 + $0x20] ss:$4 sm:$0xff] %v614_v7  ;;  %v3296_v7 = vsel %vm554_vm1, %v3244_v21, %v3237_v57 }
  0xe5   : > { %v766_v38 = vld.sshfl [vmem:[#allocation1] sm:$0xff pattern:$0x73625140]  ;;  %v767_v33 = vld.sshfl [vmem:[#allocation1 + $0x8] sm:$0xff pattern:$0x73625140] }
  0xe6   : > { %v769_v2 = vld.sshfl [vmem:[#allocation1 + $0x20] sm:$0xff pattern:$0x73625140]  ;;  %v770_v9 = vld.sshfl [vmem:[#allocation1 + $0x28] sm:$0xff pattern:$0x73625140] }
  0xe7   : > { %771 = vst [vmem:[#allocation1] ss:$4 sm:$0xff] %v616_v8  ;;  %v1437_v16 = vsel %vm552_vm0, %v766_v38, 0.0  ;;  %v1451_v6 = vsel %vm552_vm0, %v769_v2, 0.0  ;;  %v3271_v8 = vsel %vm557_vm2, %v3178_v39, %v3162_v18  ;;  %v3276_v2 = vsel %vm560_vm3, %v3162_v18, %v3178_v39 }
  0xe8   : > { %774 = vst [vmem:[#allocation1 + $0x20] ss:$4 sm:$0xff] %v618_v34  ;;  %v1438_v27 = vrot.slane %v1437_v16, 4  ;;  %v1452_v20 = vrot.slane %v1451_v6, 4  ;;  %v3286_v34 = vsel %vm557_vm2, %v3241_v45, %v3184_v17  ;;  %v3291_v38 = vsel %vm560_vm3, %v3184_v17, %v3241_v45 }
  0xe9   : > { %3952 = vst [vmem:[#allocation55_spill] sm:$0xff] %v3271_v8 }
  0xea   : > { %3953 = vst [vmem:[#allocation56_spill] sm:$0xff] %v3276_v2  ;;  %v1439_v51 = vadd.f32 %v1438_v27, %v1437_v16  ;;  %v1453_v5 = vadd.f32 %v1452_v20, %v1451_v6  ;;  %v3321_v20 = vsel %vm552_vm0, %v3167_v29, %v3154_v3  ;;  %v3957_v29 = vrot.slane %v3190_v52, 2 }
  0xeb   : > { %3955 = vst [vmem:[#allocation58_spill] sm:$0xff] %v3286_v34 }
  0xec   : > { %3956 = vst [vmem:[#allocation59_spill] sm:$0xff] %v3291_v38  ;;  %v1440_v58 = vrot.slane %v1439_v51, 2  ;;  %v1454_v16 = vrot.slane %v1453_v5, 2 }
  0xee   : > { %v772_v48 = vld.sshfl [vmem:[#allocation1] sm:$0xff pattern:$0x73625140]  ;;  %v773_v40 = vld.sshfl [vmem:[#allocation1 + $0x8] sm:$0xff pattern:$0x73625140]  ;;  %v1441_v55 = vadd.f32 %v1440_v58, %v1439_v51  ;;  %v1455_v31 = vadd.f32 %v1454_v16, %v1453_v5  ;;  %v3326_v58 = vsel %vm552_vm0, %v3174_v30, %v3156_v32  ;;  %v3331_v5 = vsel %vm552_vm0, %v3176_v24, %v3160_v10 }
  0xef   : > { %v775_v51 = vld.sshfl [vmem:[#allocation1 + $0x20] sm:$0xff pattern:$0x73625140]  ;;  %v776_v16 = vld.sshfl [vmem:[#allocation1 + $0x28] sm:$0xff pattern:$0x73625140] }
  0xf0   : > { %777 = vst [vmem:[#allocation1] ss:$4 sm:$0xff] %v619_v4  ;;  %v1442_v27 = vrot.slane %v1441_v55, 1  ;;  %v1456_v6 = vrot.slane %v1455_v31, 1  ;;  %v1465_v1 = vsel %vm552_vm0, %v772_v48, 0.0  ;;  %v1479_v3 = vsel %vm552_vm0, %v775_v51, 0.0 }
  0xf1   : > { %780 = vst [vmem:[#allocation1 + $0x20] ss:$4 sm:$0xff] %v3957_v29  ;;  %v1466_v53 = vrot.slane %v1465_v1, 4  ;;  %v1480_v32 = vrot.slane %v1479_v3, 4  ;;  %v1444_v24 = vsel %vm552_vm0, %v767_v33, 0.0  ;;  %v1458_v48 = vsel %vm552_vm0, %v770_v9, 0.0 }
  0xf2   : > { %v1443_v10 = vadd.f32 %v1442_v27, %v1441_v55  ;;  %v1445_v59 = vrot.slane %v1444_v24, 4  ;;  %v1457_v51 = vadd.f32 %v1456_v6, %v1455_v31  ;;  %v1459_v2 = vrot.slane %v1458_v48, 4 }
  0xf3   : > { %v1467_v4 = vadd.f32 %v1466_v53, %v1465_v1  ;;  %v1481_v34 = vadd.f32 %v1480_v32, %v1479_v3  ;;  %v1472_v52 = vsel %vm552_vm0, %v773_v40, 0.0  ;;  %v1486_v29 = vsel %vm552_vm0, %v776_v16, 0.0 }
  0xf4   : > { %v1473_v38 = vrot.slane %v1472_v52, 4  ;;  %v1446_v55 = vadd.f32 %v1445_v59, %v1444_v24  ;;  %v1460_v27 = vadd.f32 %v1459_v2, %v1458_v48  ;;  %v1487_v35 = vrot.slane %v1486_v29, 4 }
  0xf5   : > { %v1468_v8 = vrot.slane %v1467_v4, 2  ;;  %v1482_v30 = vrot.slane %v1481_v34, 2  ;;  %v3345_v1 = vsel %vm552_vm0, %v2779_v19, 0.0  ;;  %v3350_v31 = vsel %vm552_vm0, %v3178_v39, %v3162_v18 }
  0xf6   : > { %3958 = vst [vmem:[#allocation60_spill] sm:$0xff] %v3350_v31  ;;  %v1474_v6 = vadd.f32 %v1473_v38, %v1472_v52  ;;  %v3355_v59 = vsel %vm552_vm0, %v3241_v45, %v3184_v17  ;;  %v2108_v19 = vsel %vm2045_vm4, %v1457_v51, %v1443_v10  ;;  %v1488_v3 = vadd.f32 %v1487_v35, %v1486_v29 }
  0xf7   : > { %v778_v53 = vld.sshfl [vmem:[#allocation1] sm:$0xff pattern:$0x73625140]  ;;  %v779_v40 = vld.sshfl [vmem:[#allocation1 + $0x8] sm:$0xff pattern:$0x73625140]  ;;  %v1469_v33 = vadd.f32 %v1468_v8, %v1467_v4  ;;  %v1483_v9 = vadd.f32 %v1482_v30, %v1481_v34  ;;  %v626_v18 = vsel %vm552_vm0, %v3244_v21, %v3237_v57 }
  0xf8   : > { %3959 = vst [vmem:[#allocation61_spill] sm:$0xff] %v3355_v59  ;;  %v781_v2 = vld.sshfl [vmem:[#allocation1 + $0x20] sm:$0xff pattern:$0x73625140]  ;;  %v3960_v39 = vrot.slane %v3193_v62, 4  ;;  %v1493_v38 = vsel %vm552_vm0, %v778_v53, 0.0 }
  0xf9   : > { %v782_v16 = vld.sshfl [vmem:[#allocation1 + $0x28] sm:$0xff pattern:$0x73625140]  ;;  %v1470_v8 = vrot.slane %v1469_v33, 1  ;;  %v1484_v34 = vrot.slane %v1483_v9, 1  ;;  %v1507_v32 = vsel %vm552_vm0, %v781_v2, 0.0 }
  0xfa   : > { %783 = vst [vmem:[#allocation1] ss:$4 sm:$0xff] %v3960_v39  ;;  %v3961_v17 = vrot.slane %v3196_v50, 6  ;;  %v1494_v45 = vrot.slane %v1493_v38, 4  ;;  %v1508_v30 = vrot.slane %v1507_v32, 4  ;;  %v1447_v10 = vrot.slane %v1446_v55, 2 }
  0xfb   : > { %v1461_v35 = vrot.slane %v1460_v27, 2  ;;  %v1471_v24 = vadd.f32 %v1470_v8, %v1469_v33  ;;  %v1485_v4 = vadd.f32 %v1484_v34, %v1483_v9  ;;  %v1475_v21 = vrot.slane %v1474_v6, 2 }
  0xfc   : > { %786 = vst [vmem:[#allocation1 + $0x20] ss:$4 sm:$0xff] %v3961_v17  ;;  %v1489_v57 = vrot.slane %v1488_v3, 2  ;;  %v1495_v62 = vadd.f32 %v1494_v45, %v1493_v38  ;;  %v1509_v48 = vadd.f32 %v1508_v30, %v1507_v32  ;;  %v1448_v51 = vadd.f32 %v1447_v10, %v1446_v55 }
  0xfd   : > { %v1462_v52 = vadd.f32 %v1461_v35, %v1460_v27  ;;  %v2109_v29 = vsel %vm2047_vm5, %v1471_v24, %v2108_v19  ;;  %v1476_v53 = vadd.f32 %v1475_v21, %v1474_v6  ;;  %v1500_v50 = vsel %vm552_vm0, %v779_v40, 0.0 }
  0xfe   : > { %v1490_v2 = vadd.f32 %v1489_v57, %v1488_v3  ;;  %v1496_v39 = vrot.slane %v1495_v62, 2  ;;  %v1510_v17 = vrot.slane %v1509_v48, 2  ;;  %v1449_v59 = vrot.slane %v1448_v51, 1 }
  0xff   : > { %v3371_v33 = vsel %vm552_vm0, %v2785_v25, 0.0  ;;  %v1463_v9 = vrot.slane %v1462_v52, 1  ;;  %v1477_v8 = vrot.slane %v1476_v53, 1  ;;  %v1501_v38 = vrot.slane %v1500_v50, 4 }
 0x100   : > { %v1491_v34 = vrot.slane %v1490_v2, 1  ;;  %v1497_v55 = vadd.f32 %v1496_v39, %v1495_v62  ;;  %v1511_v27 = vadd.f32 %v1510_v17, %v1509_v48  ;;  %v2110_v19 = vsel %vm2049_vm6, %v1485_v4, %v2109_v29 }
 0x101   : > { %v784_v32 = vld.sshfl [vmem:[#allocation1] sm:$0xff pattern:$0x73625140]  ;;  %v785_v6 = vld.sshfl [vmem:[#allocation1 + $0x8] sm:$0xff pattern:$0x73625140]  ;;  %v1450_v3 = vadd.f32 %v1449_v59, %v1448_v51  ;;  %v1464_v30 = vadd.f32 %v1463_v9, %v1462_v52  ;;  %v1478_v10 = vadd.f32 %v1477_v8, %v1476_v53  ;;  %v1502_v48 = vadd.f32 %v1501_v38, %v1500_v50 }
 0x102   : > { %v1521_v40 = vsel %vm552_vm0, %v784_v32, 0.0  ;;  %v1492_v35 = vadd.f32 %v1491_v34, %v1490_v2  ;;  %789 = vst [vmem:[#allocation1] ss:$4 sm:$0xff] %v626_v18  ;;  %v1498_v25 = vrot.slane %v1497_v55, 1  ;;  %v1512_v24 = vrot.slane %v1511_v27, 1 }
 0x103   : > { %v787_v45 = vld.sshfl [vmem:[#allocation1 + $0x20] sm:$0xff pattern:$0x73625140]  ;;  %v1522_v21 = vrot.slane %v1521_v40, 4  ;;  %v1514_v4 = vsel %vm552_vm0, %v782_v16, 0.0  ;;  %v1528_v59 = vsel %vm552_vm0, %v785_v6, 0.0 }
 0x104   : > { %v1535_v57 = vsel %vm552_vm0, %v787_v45, 0.0  ;;  %v788_v62 = vld.sshfl [vmem:[#allocation1 + $0x28] sm:$0xff pattern:$0x73625140]  ;;  %v1499_v51 = vadd.f32 %v1498_v25, %v1497_v55  ;;  %v1513_v29 = vadd.f32 %v1512_v24, %v1511_v27  ;;  %v1515_v52 = vrot.slane %v1514_v4, 4 }
 0x105   : > { %v1536_v31 = vrot.slane %v1535_v57, 4  ;;  %v1523_v39 = vadd.f32 %v1522_v21, %v1521_v40  ;;  %v3962_v18 = vrot.slane %v3296_v7, 2  ;;  %v1503_v2 = vrot.slane %v1502_v48, 2 }
 0x106   : > { %v1529_v17 = vrot.slane %v1528_v59, 4  ;;  %v1542_v9 = vsel %vm552_vm0, %v788_v62, 0.0  ;;  %v2111_v50 = vsel %vm2051_vm7, %v1499_v51, %v2110_v19  ;;  %v1516_v34 = vadd.f32 %v1515_v52, %v1514_v4 }
 0x107   : > { %792 = vst [vmem:[#allocation1 + $0x20] ss:$4 sm:$0xff] %v3962_v18  ;;  %v1537_v53 = vadd.f32 %v1536_v31, %v1535_v57  ;;  %v1524_v8 = vrot.slane %v1523_v39, 2  ;;  %v1543_v16 = vrot.slane %v1542_v9, 4  ;;  %v2112_v32 = vsel %vm2053_vm8, %v1513_v29, %v2111_v50 }
 0x108   : > { %v1504_v55 = vadd.f32 %v1503_v2, %v1502_v48  ;;  %v1530_v27 = vadd.f32 %v1529_v17, %v1528_v59  ;;  %v1517_v45 = vrot.slane %v1516_v34, 2  ;;  %v2115_v7 = vsel %vm2045_vm4, %v1464_v30, %v1450_v3 }
 0x109   : > { %v1538_v38 = vrot.slane %v1537_v53, 2  ;;  %v1525_v6 = vadd.f32 %v1524_v8, %v1523_v39  ;;  %v1544_v40 = vadd.f32 %v1543_v16, %v1542_v9  ;;  %v3384_v31 = vld.sshfl [vmem:[#allocation1] sm:$0xff pattern:$0x73625140]  ;;  %v2116_v57 = vsel %vm2047_vm5, %v1478_v10, %v2115_v7 }
 0x10a   : > { %v1505_v24 = vrot.slane %v1504_v55, 1  ;;  %v1531_v21 = vrot.slane %v1530_v27, 2  ;;  %v3387_v19 = vld.sshfl [vmem:[#allocation1 + $0x8] sm:$0xff pattern:$0x73625140]  ;;  %v1518_v4 = vadd.f32 %v1517_v45, %v1516_v34  ;;  %v2117_v48 = vsel %vm2049_vm6, %v1492_v35, %v2116_v57 }
 0x10b   : > { %v1539_v25 = vadd.f32 %v1538_v38, %v1537_v53  ;;  %v1526_v62 = vrot.slane %v1525_v6, 1  ;;  %v1545_v51 = vrot.slane %v1544_v40, 2  ;;  %v3963_v59 = vrot.slane %v3311_v37, 4 }
 0x10c   : > { %v1506_v39 = vadd.f32 %v1505_v24, %v1504_v55  ;;  %v1532_v3 = vadd.f32 %v1531_v21, %v1530_v27  ;;  %v990_v30 = vrot.slane %v3345_v1, 4  ;;  %v1519_v53 = vrot.slane %v1518_v4, 1 }
 0x10d   : > { %795 = vst [vmem:[#allocation1] ss:$4 sm:$0xff] %v3963_v59  ;;  %v1540_v29 = vrot.slane %v1539_v25, 1  ;;  %v1527_v18 = vadd.f32 %v1526_v62, %v1525_v6  ;;  %v1546_v10 = vadd.f32 %v1545_v51, %v1544_v40  ;;  %v1004_v2 = vrot.slane %v3371_v33, 4 }
 0x10e   : > { %v3393_v52 = vld.sshfl [vmem:[#allocation1 + $0x20] sm:$0xff pattern:$0x73625140]  ;;  %v3396_v17 = vld.sshfl [vmem:[#allocation1 + $0x28] sm:$0xff pattern:$0x73625140]  ;;  %v2118_v35 = vsel %vm2051_vm7, %v1506_v39, %v2117_v48  ;;  %v991_v37 = vadd.f32 %v990_v30, %v3345_v1  ;;  %v1520_v16 = vadd.f32 %v1519_v53, %v1518_v4 }
 0x10f   : > { %v1541_v9 = vadd.f32 %v1540_v29, %v1539_v25  ;;  %v1533_v8 = vrot.slane %v1532_v3, 1  ;;  %v3964_v50 = vrot.slane %v3316_v46, 6  ;;  %v2113_v34 = vsel %vm2055_vm9, %v1527_v18, %v2112_v32 }
 0x110   : > { %v1547_v38 = vrot.slane %v1546_v10, 1  ;;  %v1005_v55 = vadd.f32 %v1004_v2, %v3371_v33  ;;  %v992_v45 = vrot.slane %v991_v37, 2  ;;  %v1017_v40 = vsel %vm552_vm0, %v2797_v41, 0.0 }
 0x111   : > { %798 = vst [vmem:[#allocation1 + $0x20] ss:$4 sm:$0xff] %v3964_v50  ;;  %v2114_v27 = vsel %vm2057_vm10, %v1541_v9, %v2113_v34  ;;  %v1534_v6 = vadd.f32 %v1533_v8, %v1532_v3  ;;  %v2119_v1 = vsel %vm2053_vm8, %v1520_v16, %v2118_v35  ;;  %v1018_v46 = vrot.slane %v1017_v40, 4 }
 0x112   : > { %2208 = vmatmul.f32.vlgmr.msra.gmra.mxu2 %v2114_v27  ;;  %v1548_v7 = vadd.f32 %v1547_v38, %v1546_v10  ;;  %v1006_v25 = vrot.slane %v1005_v55, 2  ;;  %v993_v32 = vadd.f32 %v992_v45, %v991_v37  ;;  %v1031_v21 = vsel %vm552_vm0, %v2801_v44, 0.0 }
 0x113   : > { %v2120_v24 = vsel %vm2055_vm9, %v1534_v6, %v2119_v1  ;;  %v1045_v33 = vsel %vm552_vm0, %v2813_v60, 0.0  ;;  %v1019_v4 = vadd.f32 %v1018_v46, %v1017_v40  ;;  %v1032_v51 = vrot.slane %v1031_v21, 4 }
 0x114   : > { %v3413_v57 = vld.sshfl [vmem:[#allocation1] sm:$0xff pattern:$0x73625140]  ;;  %v2121_v62 = vsel %vm2057_vm10, %v1548_v7, %v2120_v24  ;;  %v1007_v41 = vadd.f32 %v1006_v25, %v1005_v55  ;;  %v3416_v48 = vld.sshfl [vmem:[#allocation1 + $0x8] sm:$0xff pattern:$0x73625140] }
 0x115   : > { %2249 = vmatmul.f32.vlgmr.msra.gmra.mxu3 %v2121_v62  ;;  %v994_v59 = vrot.slane %v993_v32, 1  ;;  %v1046_v29 = vrot.slane %v1045_v33, 4  ;;  %v1059_v39 = vsel %vm552_vm0, %v2817_v63, 0.0  ;;  %v1073_v44 = vsel %vm552_vm0, %v2829_v12, 0.0  ;;  %801 = vst [vmem:[#allocation1] ss:$4 sm:$0xff] %v3321_v20 }
 0x116   : > { %v1008_v60 = vrot.slane %v1007_v41, 1  ;;  %v1020_v3 = vrot.slane %v1019_v4, 2  ;;  %v1033_v30 = vadd.f32 %v1032_v51, %v1031_v21  ;;  %v1060_v18 = vrot.slane %v1059_v39, 4 }
 0x117   : > { %v995_v10 = vadd.f32 %v994_v59, %v993_v32  ;;  %v1047_v2 = vadd.f32 %v1046_v29, %v1045_v33  ;;  %v1074_v9 = vrot.slane %v1073_v44, 4  ;;  %v1087_v8 = vsel %vm552_vm0, %v2833_v14, 0.0 }
 0x118   : > { %v3423_v53 = vld.sshfl [vmem:[#allocation1 + $0x20] sm:$0xff pattern:$0x73625140]  ;;  %v3427_v35 = vld.sshfl [vmem:[#allocation1 + $0x28] sm:$0xff pattern:$0x73625140]  ;;  %v1009_v63 = vadd.f32 %v1008_v60, %v1007_v41  ;;  %v1021_v37 = vadd.f32 %v1020_v3, %v1019_v4  ;;  %v1061_v12 = vadd.f32 %v1060_v18, %v1059_v39 }
 0x119   : > { %v1034_v50 = vrot.slane %v1033_v30, 2  ;;  %v3965_v20 = vrot.slane %v3201_v28, 2  ;;  %v1048_v34 = vrot.slane %v1047_v2, 2  ;;  %v1075_v16 = vadd.f32 %v1074_v9, %v1073_v44 }
 0x11a   : > { %v1088_v38 = vrot.slane %v1087_v8, 4  ;;  %v996_v55 = vsel %vm552_vm0, %v2783_v22, 0.0  ;;  %v1022_v27 = vrot.slane %v1021_v37, 1  ;;  %v1062_v45 = vrot.slane %v1061_v12, 2 }
 0x11b   : > { %804 = vst [vmem:[#allocation1 + $0x20] ss:$4 sm:$0xff] %v3965_v20  ;;  %v1035_v6 = vadd.f32 %v1034_v50, %v1033_v30  ;;  %v2046_v14 = vsel %vm2045_vm4, %v1009_v63, %v995_v10  ;;  %v1049_v40 = vadd.f32 %v1048_v34, %v1047_v2  ;;  %v1076_v7 = vrot.slane %v1075_v16, 2 }
 0x11c   : > { %v1089_v1 = vadd.f32 %v1088_v38, %v1087_v8  ;;  %v997_v25 = vrot.slane %v996_v55, 4  ;;  %v1023_v46 = vadd.f32 %v1022_v27, %v1021_v37  ;;  %v1063_v32 = vadd.f32 %v1062_v45, %v1061_v12  ;;  %v3436_v21 = vld.sshfl [vmem:[#allocation1] sm:$0xff pattern:$0x73625140] }
 0x11d   : > { %v1036_v24 = vrot.slane %v1035_v6, 1  ;;  %v1010_v28 = vsel %vm552_vm0, %v2787_v26, 0.0  ;;  %v1050_v33 = vrot.slane %v1049_v40, 1  ;;  %v1077_v62 = vadd.f32 %v1076_v7, %v1075_v16  ;;  %v3438_v4 = vld.sshfl [vmem:[#allocation1 + $0x8] sm:$0xff pattern:$0x73625140] }
 0x11e   : > { %v1090_v22 = vrot.slane %v1089_v1, 2  ;;  %v998_v41 = vadd.f32 %v997_v25, %v996_v55  ;;  %v1064_v59 = vrot.slane %v1063_v32, 1  ;;  %v2048_v29 = vsel %vm2047_vm5, %v1023_v46, %v2046_v14 }
 0x11f   : > { %v1037_v51 = vadd.f32 %v1036_v24, %v1035_v6  ;;  %v1011_v39 = vrot.slane %v1010_v28, 4  ;;  %v3966_v44 = vrot.slane %v3206_v43, 4  ;;  %v1051_v60 = vadd.f32 %v1050_v33, %v1049_v40 }
 0x120   : > { %v1078_v3 = vrot.slane %v1077_v62, 1  ;;  %v1091_v30 = vadd.f32 %v1090_v22, %v1089_v1  ;;  %v999_v26 = vrot.slane %v998_v41, 2  ;;  %v1065_v10 = vadd.f32 %v1064_v59, %v1063_v32 }
 0x121   : > { %807 = vst [vmem:[#allocation1] ss:$4 sm:$0xff] %v3966_v44  ;;  %v2050_v2 = vsel %vm2049_vm6, %v1037_v51, %v2048_v29  ;;  %v1012_v9 = vadd.f32 %v1011_v39, %v1010_v28  ;;  %v1024_v8 = vsel %vm552_vm0, %v2799_v42, 0.0  ;;  %v3967_v20 = vrot.slane %v3211_v49, 6 }
 0x122   : > { %v3443_v18 = vld.sshfl [vmem:[#allocation1 + $0x20] sm:$0xff pattern:$0x73625140]  ;;  %v3448_v63 = vld.sshfl [vmem:[#allocation1 + $0x28] sm:$0xff pattern:$0x73625140]  ;;  %v1079_v37 = vadd.f32 %v1078_v3, %v1077_v62  ;;  %v2052_v43 = vsel %vm2051_vm7, %v1051_v60, %v2050_v2  ;;  %v1000_v12 = vadd.f32 %v999_v26, %v998_v41 }
 0x123   : > { %v1092_v50 = vrot.slane %v1091_v30, 1  ;;  %810 = vst [vmem:[#allocation1 + $0x20] ss:$4 sm:$0xff] %v3967_v20  ;;  %v2054_v34 = vsel %vm2053_vm8, %v1065_v10, %v2052_v43  ;;  %v1013_v16 = vrot.slane %v1012_v9, 2  ;;  %v1025_v38 = vrot.slane %v1024_v8, 4 }
 0x124   : > { %v1038_v55 = vsel %vm552_vm0, %v2805_v47, 0.0  ;;  %v2056_v42 = vsel %vm2055_vm9, %v1079_v37, %v2054_v34  ;;  %v1001_v6 = vrot.slane %v1000_v12, 1  ;;  %v1052_v7 = vsel %vm552_vm0, %v2815_v61, 0.0 }
 0x125   : > { %v1093_v27 = vadd.f32 %v1092_v50, %v1091_v30  ;;  %v1039_v45 = vrot.slane %v1038_v55, 4  ;;  %v1014_v14 = vadd.f32 %v1013_v16, %v1012_v9  ;;  %v1026_v40 = vadd.f32 %v1025_v38, %v1024_v8 }
 0x126   : > { %v1066_v49 = vsel %vm552_vm0, %v2819_v0, 0.0  ;;  %v1002_v25 = vadd.f32 %v1001_v6, %v1000_v12  ;;  %v1053_v24 = vrot.slane %v1052_v7, 4  ;;  %v1080_v62 = vsel %vm552_vm0, %v2831_v13, 0.0 }
 0x127   : > { %v2058_v1 = vsel %vm2057_vm10, %v1093_v27, %v2056_v42  ;;  %v1040_v46 = vadd.f32 %v1039_v45, %v1038_v55  ;;  %v1015_v47 = vrot.slane %v1014_v14, 1  ;;  %v1027_v28 = vrot.slane %v1026_v40, 2 }
 0x128   : > { %v3462_v32 = vld.sshfl [vmem:[#allocation1] sm:$0xff pattern:$0x73625140]  ;;  %2196 = vmatmul.f32.vlgmr.msra.gmra.mxu0 %v2058_v1  ;;  %v1067_v33 = vrot.slane %v1066_v49, 4  ;;  %v1054_v41 = vadd.f32 %v1053_v24, %v1052_v7  ;;  %v1081_v61 = vrot.slane %v1080_v62, 4  ;;  %v1094_v0 = vsel %vm552_vm0, %v2835_v15, 0.0 }
 0x129   : > { %v1041_v22 = vrot.slane %v1040_v46, 2  ;;  %v3468_v51 = vld.sshfl [vmem:[#allocation1 + $0x8] sm:$0xff pattern:$0x73625140]  ;;  %v1016_v59 = vadd.f32 %v1015_v47, %v1014_v14  ;;  %v1028_v29 = vadd.f32 %v1027_v28, %v1026_v40  ;;  %v1095_v44 = vrot.slane %v1094_v0, 4 }
 0x12a   : > { %v1068_v39 = vadd.f32 %v1067_v33, %v1066_v49  ;;  %v3470_v60 = vld.sshfl [vmem:[#allocation1 + $0x20] sm:$0xff pattern:$0x73625140]  ;;  %813 = vst [vmem:[#allocation1] ss:$4 sm:$0xff] %v3326_v58  ;;  %v1055_v30 = vrot.slane %v1054_v41, 2  ;;  %v1082_v26 = vadd.f32 %v1081_v61, %v1080_v62 }
 0x12b   : > { %v1042_v3 = vadd.f32 %v1041_v22, %v1040_v46  ;;  %v1549_v13 = vsel %vm552_vm0, %v3384_v31, 0.0  ;;  %v3475_v10 = vld.sshfl [vmem:[#allocation1 + $0x28] sm:$0xff pattern:$0x73625140]  ;;  %v1029_v2 = vrot.slane %v1028_v29, 1  ;;  %v1096_v9 = vadd.f32 %v1095_v44, %v1094_v0 }
 0x12c   : > { %v1069_v15 = vrot.slane %v1068_v39, 2  ;;  %v2059_v8 = vsel %vm2045_vm4, %v1016_v59, %v1002_v25  ;;  %v3968_v37 = vrot.slane %v3216_v11, 2  ;;  %v1056_v43 = vadd.f32 %v1055_v30, %v1054_v41 }
 0x12d   : > { %v1043_v50 = vrot.slane %v1042_v3, 1  ;;  %v1083_v12 = vrot.slane %v1082_v26, 2  ;;  %v1550_v58 = vrot.slane %v1549_v13, 4  ;;  %v1030_v20 = vadd.f32 %v1029_v2, %v1028_v29 }
 0x12e   : > { %816 = vst [vmem:[#allocation1 + $0x20] ss:$4 sm:$0xff] %v3968_v37  ;;  %v1070_v34 = vadd.f32 %v1069_v15, %v1068_v39  ;;  %v1097_v16 = vrot.slane %v1096_v9, 2  ;;  %v1563_v31 = vsel %vm552_vm0, %v3393_v52, 0.0  ;;  %v1057_v55 = vrot.slane %v1056_v43, 1 }
 0x12f   : > { %v1044_v38 = vadd.f32 %v1043_v50, %v1042_v3  ;;  %v1084_v27 = vadd.f32 %v1083_v12, %v1082_v26  ;;  %v1551_v42 = vadd.f32 %v1550_v58, %v1549_v13  ;;  %v2060_v14 = vsel %vm2047_vm5, %v1030_v20, %v2059_v8 }
 0x130   : > { %v1071_v6 = vrot.slane %v1070_v34, 1  ;;  %v1098_v45 = vadd.f32 %v1097_v16, %v1096_v9  ;;  %v1564_v11 = vrot.slane %v1563_v31, 4  ;;  %v1058_v40 = vadd.f32 %v1057_v55, %v1056_v43 }
 0x131   : > { %v1085_v7 = vrot.slane %v1084_v27, 1  ;;  %v2061_v49 = vsel %vm2049_vm6, %v1044_v38, %v2060_v14  ;;  %v1552_v1 = vrot.slane %v1551_v42, 2  ;;  %v3484_v25 = vld.sshfl [vmem:[#allocation1] sm:$0xff pattern:$0x73625140]  ;;  %v1577_v52 = vsel %vm552_vm0, %v3413_v57, 0.0 }
 0x132   : > { %v1072_v46 = vadd.f32 %v1071_v6, %v1070_v34  ;;  %v1099_v24 = vrot.slane %v1098_v45, 1  ;;  %v1565_v47 = vadd.f32 %v1564_v11, %v1563_v31  ;;  %v3488_v28 = vld.sshfl [vmem:[#allocation1 + $0x8] sm:$0xff pattern:$0x73625140]  ;;  %v2062_v62 = vsel %vm2051_vm7, %v1058_v40, %v2061_v49 }
 0x133   : > { %v1086_v33 = vadd.f32 %v1085_v7, %v1084_v27  ;;  %v1553_v22 = vadd.f32 %v1552_v1, %v1551_v42  ;;  %v1578_v41 = vrot.slane %v1577_v52, 4  ;;  %v3969_v0 = vrot.slane %v3221_v54, 4 }
 0x134   : > { %v1100_v59 = vadd.f32 %v1099_v24, %v1098_v45  ;;  %v2063_v29 = vsel %vm2053_vm8, %v1072_v46, %v2062_v62  ;;  %v1566_v39 = vrot.slane %v1565_v47, 2  ;;  %v1591_v44 = vsel %vm552_vm0, %v3423_v53, 0.0 }
 0x135   : > { %v3491_v61 = vld.sshfl [vmem:[#allocation1 + $0x20] sm:$0xff pattern:$0x73625140]  ;;  %819 = vst [vmem:[#allocation1] ss:$4 sm:$0xff] %v3969_v0  ;;  %v2064_v3 = vsel %vm2055_vm9, %v1086_v33, %v2063_v29  ;;  %v1554_v30 = vrot.slane %v1553_v22, 1  ;;  %v1579_v26 = vadd.f32 %v1578_v41, %v1577_v52 }
 0x136   : > { %v3498_v57 = vld.sshfl [vmem:[#allocation1 + $0x28] sm:$0xff pattern:$0x73625140]  ;;  %v1592_v13 = vrot.slane %v1591_v44, 4  ;;  %v3970_v2 = vrot.slane %v3226_v56, 6  ;;  %v2065_v54 = vsel %vm2057_vm10, %v1100_v59, %v2064_v3  ;;  %v1567_v15 = vadd.f32 %v1566_v39, %v1565_v47 }
 0x137   : > { %v1605_v9 = vsel %vm552_vm0, %v3436_v21, 0.0  ;;  %v1619_v8 = vsel %vm552_vm0, %v3443_v18, 0.0  ;;  %2237 = vmatmul.f32.vlgmr.msra.gmra.mxu1 %v2065_v54  ;;  %v1555_v53 = vadd.f32 %v1554_v30, %v1553_v22  ;;  %v1580_v37 = vrot.slane %v1579_v26, 2 }
 0x138   : > { %822 = vst [vmem:[#allocation1 + $0x20] ss:$4 sm:$0xff] %v3970_v2  ;;  %v1593_v50 = vadd.f32 %v1592_v13, %v1591_v44  ;;  %v1606_v43 = vrot.slane %v1605_v9, 4  ;;  %v1568_v12 = vrot.slane %v1567_v15, 1  ;;  %v1620_v58 = vrot.slane %v1619_v8, 4 }
 0x139   : > { %v1633_v56 = vsel %vm552_vm0, %v3462_v32, 0.0  ;;  %v1647_v20 = vsel %vm552_vm0, %v3470_v60, 0.0  ;;  %v1581_v34 = vadd.f32 %v1580_v37, %v1579_v26  ;;  %v1556_v27 = vsel %vm552_vm0, %v3387_v19, 0.0 }
 0x13a   : > { %v1594_v16 = vrot.slane %v1593_v50, 2  ;;  %v1607_v31 = vadd.f32 %v1606_v43, %v1605_v9  ;;  %v1634_v21 = vrot.slane %v1633_v56, 4  ;;  %v1569_v38 = vadd.f32 %v1568_v12, %v1567_v15 }
 0x13b   : > { %v1621_v55 = vadd.f32 %v1620_v58, %v1619_v8  ;;  %v1648_v18 = vrot.slane %v1647_v20, 4  ;;  %v1582_v6 = vrot.slane %v1581_v34, 1  ;;  %v1557_v49 = vrot.slane %v1556_v27, 4 }
 0x13c   : > { %v3514_v42 = vld.sshfl [vmem:[#allocation1] sm:$0xff pattern:$0x73625140]  ;;  %v1595_v45 = vadd.f32 %v1594_v16, %v1593_v50  ;;  %v1608_v14 = vrot.slane %v1607_v31, 2  ;;  %v1635_v11 = vadd.f32 %v1634_v21, %v1633_v56  ;;  %v2122_v7 = vsel %vm2045_vm4, %v1569_v38, %v1555_v53 }
 0x13d   : > { %v3516_v32 = vld.sshfl [vmem:[#allocation1 + $0x8] sm:$0xff pattern:$0x73625140]  ;;  %v1622_v40 = vrot.slane %v1621_v55, 2  ;;  %v1649_v60 = vadd.f32 %v1648_v18, %v1647_v20  ;;  %v1583_v46 = vadd.f32 %v1582_v6, %v1581_v34  ;;  %v1558_v22 = vadd.f32 %v1557_v49, %v1556_v27 }
 0x13e   : > { %v1596_v24 = vrot.slane %v1595_v45, 1  ;;  %v1609_v47 = vadd.f32 %v1608_v14, %v1607_v31  ;;  %v1636_v52 = vrot.slane %v1635_v11, 2  ;;  %v1570_v41 = vsel %vm552_vm0, %v3396_v17, 0.0  ;;  %825 = vst [vmem:[#allocation1] ss:$4 sm:$0xff] %v3331_v5 }
 0x13f   : > { %v3519_v1 = vld.sshfl [vmem:[#allocation1 + $0x20] sm:$0xff pattern:$0x73625140]  ;;  %v3521_v19 = vld.sshfl [vmem:[#allocation1 + $0x28] sm:$0xff pattern:$0x73625140]  ;;  %v1623_v33 = vadd.f32 %v1622_v40, %v1621_v55  ;;  %v2123_v39 = vsel %vm2047_vm5, %v1583_v46, %v2122_v7 }
 0x140   : > { %v1650_v62 = vrot.slane %v1649_v60, 2  ;;  %v1597_v0 = vadd.f32 %v1596_v24, %v1595_v45  ;;  %v1610_v59 = vrot.slane %v1609_v47, 1  ;;  %v1637_v29 = vadd.f32 %v1636_v52, %v1635_v11 }
 0x141   : > { %v3971_v44 = vrot.slane %v3249_v23, 2  ;;  %v1624_v3 = vrot.slane %v1623_v33, 1  ;;  %v1559_v26 = vrot.slane %v1558_v22, 2  ;;  %v1571_v13 = vrot.slane %v1570_v41, 4 }
 0x142   : > { %v1651_v30 = vadd.f32 %v1650_v62, %v1649_v60  ;;  %v1611_v2 = vadd.f32 %v1610_v59, %v1609_v47  ;;  %v1638_v54 = vrot.slane %v1637_v29, 1  ;;  %v2124_v15 = vsel %vm2049_vm6, %v1597_v0, %v2123_v39 }
 0x143   : > { %828 = vst [vmem:[#allocation1 + $0x20] ss:$4 sm:$0xff] %v3971_v44  ;;  %v1584_v17 = vsel %vm552_vm0, %v3416_v48, 0.0  ;;  %v1625_v5 = vadd.f32 %v1624_v3, %v1623_v33  ;;  %v1560_v8 = vadd.f32 %v1559_v26, %v1558_v22  ;;  %v1572_v53 = vadd.f32 %v1571_v13, %v1570_v41  ;;  %v3972_v33 = vld [vmem:[#allocation5_spill] sm:$0xff] }
 0x144   : > { %v1652_v9 = vrot.slane %v1651_v30, 1  ;;  %v1639_v37 = vadd.f32 %v1638_v54, %v1637_v29  ;;  %v2125_v50 = vsel %vm2051_vm7, %v1611_v2, %v2124_v15  ;;  %v1585_v23 = vrot.slane %v1584_v17, 4 }
 0x145   : > { %v1598_v43 = vsel %vm552_vm0, %v3427_v35, 0.0  ;;  %v2126_v58 = vsel %vm2053_vm8, %v1625_v5, %v2125_v50  ;;  %v1561_v56 = vrot.slane %v1560_v8, 1  ;;  %v1573_v20 = vrot.slane %v1572_v53, 2  ;;  %v3539_v21 = vld.sshfl [vmem:[#allocation1] sm:$0xff pattern:$0x73625140] }
 0x146   : > { %v1653_v12 = vadd.f32 %v1652_v9, %v1651_v30  ;;  %v2127_v34 = vsel %vm2055_vm9, %v1639_v37, %v2126_v58  ;;  %v1586_v16 = vadd.f32 %v1585_v23, %v1584_v17  ;;  %v1599_v48 = vrot.slane %v1598_v43, 4  ;;  %v3542_v35 = vld.sshfl [vmem:[#allocation1 + $0x8] sm:$0xff pattern:$0x73625140]  ;;  %v3976_v37 = vld [vmem:[#allocation7_spill] sm:$0xff] }
 0x147   : > { %v1612_v31 = vsel %vm552_vm0, %v3438_v4, 0.0  ;;  %v1562_v55 = vadd.f32 %v1561_v56, %v1560_v8  ;;  %v1574_v18 = vadd.f32 %v1573_v20, %v1572_v53  ;;  %v1626_v14 = vsel %vm552_vm0, %v3448_v63, 0.0  ;;  %v3973_v63 = vld [vmem:[#allocation53_spill] sm:$0xff] }
 0x148   : > { %v2128_v38 = vsel %vm2057_vm10, %v1653_v12, %v2127_v34  ;;  %v1613_v27 = vrot.slane %v1612_v31, 4  ;;  %v1587_v6 = vrot.slane %v1586_v16, 2  ;;  %v1600_v45 = vadd.f32 %v1599_v48, %v1598_v43 }
 0x149   : > { %2211 = vmatmul.f32.gmra.mxu2 %v2128_v38  ;;  %v1640_v11 = vsel %vm552_vm0, %v3468_v51, 0.0  ;;  %v1575_v4 = vrot.slane %v1574_v18, 1  ;;  %v1627_v7 = vrot.slane %v1626_v14, 4  ;;  %v1654_v52 = vsel %vm552_vm0, %v3475_v10, 0.0 }
 0x14a   : > { %v3548_v40 = vld.sshfl [vmem:[#allocation1 + $0x20] sm:$0xff pattern:$0x73625140]  ;;  %v1614_v60 = vadd.f32 %v1613_v27, %v1612_v31  ;;  %v1641_v49 = vrot.slane %v1640_v11, 4  ;;  %v1588_v24 = vadd.f32 %v1587_v6, %v1586_v16  ;;  %v1601_v47 = vrot.slane %v1600_v45, 2 }
 0x14b   : > { %v3550_v46 = vld.sshfl [vmem:[#allocation1 + $0x28] sm:$0xff pattern:$0x73625140]  ;;  %v1101_v62 = vsel %vm552_vm0, %v3972_v33, 0.0  ;;  %v3974_v22 = vrot.slane %v3973_v63, 4  ;;  %v1576_v51 = vadd.f32 %v1575_v4, %v1574_v18  ;;  %v1628_v0 = vadd.f32 %v1627_v7, %v1626_v14  ;;  %v3979_v33 = vld [vmem:[#allocation60_spill] sm:$0xff] }
 0x14c   : > { %v1615_v41 = vrot.slane %v1614_v60, 2  ;;  %v1642_v59 = vadd.f32 %v1641_v49, %v1640_v11  ;;  %v3975_v29 = vrot.slane %v3261_v36, 6  ;;  %v1589_v39 = vrot.slane %v1588_v24, 1 }
 0x14d   : > { %831 = vst [vmem:[#allocation1] ss:$4 sm:$0xff] %v3974_v22  ;;  %v1602_v44 = vadd.f32 %v1601_v47, %v1600_v45  ;;  %v1655_v3 = vrot.slane %v1654_v52, 4  ;;  %v1102_v30 = vrot.slane %v1101_v62, 4  ;;  %v1629_v13 = vrot.slane %v1628_v0, 2  ;;  %v3978_v47 = vld [vmem:[#allocation11_spill] sm:$0xff] }
 0x14e   : > { %834 = vst [vmem:[#allocation1 + $0x20] ss:$4 sm:$0xff] %v3975_v29  ;;  %v1616_v26 = vadd.f32 %v1615_v41, %v1614_v60  ;;  %v1643_v10 = vrot.slane %v1642_v59, 2  ;;  %v2129_v2 = vsel %vm2045_vm4, %v1576_v51, %v1562_v55  ;;  %v1590_v54 = vadd.f32 %v1589_v39, %v1588_v24  ;;  %v3977_v55 = vld [vmem:[#allocation9_spill] sm:$0xff] }
 0x14f   : > { %v1603_v15 = vrot.slane %v1602_v44, 1  ;;  %v1656_v17 = vadd.f32 %v1655_v3, %v1654_v52  ;;  %v1103_v5 = vadd.f32 %v1102_v30, %v1101_v62  ;;  %v1630_v8 = vadd.f32 %v1629_v13, %v1628_v0  ;;  %v3980_v51 = vld [vmem:[#allocation13_spill] sm:$0xff]  ;;  %v3981_v0 = vld [vmem:[#allocation54_spill] sm:$0xff] }
 0x150   : > { %v1617_v9 = vrot.slane %v1616_v26, 1  ;;  %v1644_v53 = vadd.f32 %v1643_v10, %v1642_v59  ;;  %v1115_v36 = vsel %vm552_vm0, %v3976_v37, 0.0  ;;  %v2130_v43 = vsel %vm2047_vm5, %v1590_v54, %v2129_v2  ;;  %v3983_v10 = vld [vmem:[#allocation15_spill] sm:$0xff] }
 0x151   : > { %v1604_v50 = vadd.f32 %v1603_v15, %v1602_v44  ;;  %v1657_v23 = vrot.slane %v1656_v17, 2  ;;  %v1104_v12 = vrot.slane %v1103_v5, 2  ;;  %v1631_v56 = vrot.slane %v1630_v8, 1 }
 0x152   : > { %v1618_v58 = vadd.f32 %v1617_v9, %v1616_v26  ;;  %v1645_v20 = vrot.slane %v1644_v53, 1  ;;  %v1116_v34 = vrot.slane %v1115_v36, 4  ;;  %v1129_v18 = vsel %vm552_vm0, %v3977_v55, 0.0 }
 0x153   : > { %v1658_v48 = vadd.f32 %v1657_v23, %v1656_v17  ;;  %v2131_v31 = vsel %vm2049_vm6, %v1604_v50, %v2130_v43  ;;  %v1105_v38 = vadd.f32 %v1104_v12, %v1103_v5  ;;  %v1632_v6 = vadd.f32 %v1631_v56, %v1630_v8  ;;  %v3984_v5 = vld [vmem:[#allocation17_spill] sm:$0xff]  ;;  %v3985_v43 = vld [vmem:[#allocation19_spill] sm:$0xff] }
 0x154   : > { %v3564_v16 = vld.sshfl [vmem:[#allocation1] sm:$0xff pattern:$0x73625140]  ;;  %v1646_v45 = vadd.f32 %v1645_v20, %v1644_v53  ;;  %v2132_v14 = vsel %vm2051_vm7, %v1618_v58, %v2131_v31  ;;  %v1117_v11 = vadd.f32 %v1116_v34, %v1115_v36  ;;  %v3572_v4 = vld.sshfl [vmem:[#allocation1 + $0x8] sm:$0xff pattern:$0x73625140] }
 0x155   : > { %v3569_v27 = vld.sshfl [vmem:[#allocation1 + $0x20] sm:$0xff pattern:$0x73625140]  ;;  %v3574_v60 = vld.sshfl [vmem:[#allocation1 + $0x28] sm:$0xff pattern:$0x73625140]  ;;  %v2133_v62 = vsel %vm2053_vm8, %v1632_v6, %v2132_v14 }
 0x156   : > { %v1659_v7 = vrot.slane %v1658_v48, 1  ;;  %v1106_v49 = vrot.slane %v1105_v38, 1  ;;  %v1130_v24 = vrot.slane %v1129_v18, 4  ;;  %v1143_v52 = vsel %vm552_vm0, %v3978_v47, 0.0  ;;  %837 = vst [vmem:[#allocation1] ss:$4 sm:$0xff] %v3979_v33 }
 0x157   : > { %v1118_v63 = vrot.slane %v1117_v11, 2  ;;  %v1144_v22 = vrot.slane %v1143_v52, 4  ;;  %v1157_v41 = vsel %vm552_vm0, %v3980_v51, 0.0  ;;  %v3982_v59 = vrot.slane %v3981_v0, 2  ;;  %v3986_v58 = vld [vmem:[#allocation6_spill] sm:$0xff] }
 0x158   : > { %v1660_v29 = vadd.f32 %v1659_v7, %v1658_v48  ;;  %v2134_v39 = vsel %vm2055_vm9, %v1646_v45, %v2133_v62  ;;  %v1107_v44 = vadd.f32 %v1106_v49, %v1105_v38  ;;  %v1131_v3 = vadd.f32 %v1130_v24, %v1129_v18 }
 0x159   : > { %840 = vst [vmem:[#allocation1 + $0x20] ss:$4 sm:$0xff] %v3982_v59  ;;  %v1119_v30 = vadd.f32 %v1118_v63, %v1117_v11  ;;  %v1145_v26 = vadd.f32 %v1144_v22, %v1143_v52  ;;  %v1158_v13 = vrot.slane %v1157_v41, 4  ;;  %v1171_v2 = vsel %vm552_vm0, %v3983_v10, 0.0  ;;  %v3987_v22 = vld [vmem:[#allocation8_spill] sm:$0xff] }
 0x15a   : > { %v2135_v54 = vsel %vm2057_vm10, %v1660_v29, %v2134_v39  ;;  %v1132_v15 = vrot.slane %v1131_v3, 2  ;;  %v1172_v17 = vrot.slane %v1171_v2, 4  ;;  %v1185_v9 = vsel %vm552_vm0, %v3984_v5, 0.0 }
 0x15b   : > { %2252 = vmatmul.f32.gmra.mxu3 %v2135_v54  ;;  %v1120_v8 = vrot.slane %v1119_v30, 1  ;;  %v1146_v53 = vrot.slane %v1145_v26, 2  ;;  %v1159_v37 = vadd.f32 %v1158_v13, %v1157_v41  ;;  %v1186_v36 = vrot.slane %v1185_v9, 4 }
 0x15c   : > { %v1133_v50 = vadd.f32 %v1132_v15, %v1131_v3  ;;  %v1173_v23 = vadd.f32 %v1172_v17, %v1171_v2  ;;  %v1199_v12 = vsel %vm552_vm0, %v3985_v43, 0.0  ;;  %v1108_v56 = vsel %vm552_vm0, %v3986_v58, 0.0  ;;  %v3988_v2 = vld [vmem:[#allocation10_spill] sm:$0xff] }
 0x15d   : > { %v1121_v20 = vadd.f32 %v1120_v8, %v1119_v30  ;;  %v1147_v34 = vadd.f32 %v1146_v53, %v1145_v26  ;;  %v1160_v48 = vrot.slane %v1159_v37, 2  ;;  %v1187_v31 = vadd.f32 %v1186_v36, %v1185_v9  ;;  %v3989_v36 = vld [vmem:[#allocation12_spill] sm:$0xff] }
 0x15e   : > { %v1134_v38 = vrot.slane %v1133_v50, 1  ;;  %v1174_v55 = vrot.slane %v1173_v23, 2  ;;  %v1200_v18 = vrot.slane %v1199_v12, 4  ;;  %v1109_v6 = vrot.slane %v1108_v56, 4 }
 0x15f   : > { %v1148_v45 = vrot.slane %v1147_v34, 1  ;;  %v1161_v14 = vadd.f32 %v1160_v48, %v1159_v37  ;;  %v1188_v11 = vrot.slane %v1187_v31, 2  ;;  %v2066_v7 = vsel %vm2045_vm4, %v1121_v20, %v1107_v44 }
 0x160   : > { %v1135_v49 = vadd.f32 %v1134_v38, %v1133_v50  ;;  %v1175_v24 = vadd.f32 %v1174_v55, %v1173_v23  ;;  %v1201_v47 = vadd.f32 %v1200_v18, %v1199_v12  ;;  %v1110_v52 = vadd.f32 %v1109_v6, %v1108_v56 }
 0x161   : > { %v1149_v33 = vadd.f32 %v1148_v45, %v1147_v34  ;;  %v1162_v62 = vrot.slane %v1161_v14, 1  ;;  %v1189_v63 = vadd.f32 %v1188_v11, %v1187_v31  ;;  %v1122_v51 = vsel %vm552_vm0, %v3987_v22, 0.0  ;;  %v3990_v34 = vld [vmem:[#allocation14_spill] sm:$0xff]  ;;  %v3991_v31 = vld [vmem:[#allocation16_spill] sm:$0xff] }
 0x162   : > { %v1176_v41 = vrot.slane %v1175_v24, 1  ;;  %v1202_v0 = vrot.slane %v1201_v47, 2  ;;  %v2067_v59 = vsel %vm2047_vm5, %v1135_v49, %v2066_v7  ;;  %v1111_v29 = vrot.slane %v1110_v52, 2  ;;  %v3992_v7 = vld [vmem:[#allocation18_spill] sm:$0xff] }
 0x163   : > { %v1163_v39 = vadd.f32 %v1162_v62, %v1161_v14  ;;  %v1190_v3 = vrot.slane %v1189_v63, 1  ;;  %v2068_v30 = vsel %vm2049_vm6, %v1149_v33, %v2067_v59  ;;  %v1123_v44 = vrot.slane %v1122_v51, 4 }
 0x164   : > { %v1177_v26 = vadd.f32 %v1176_v41, %v1175_v24  ;;  %v1203_v13 = vadd.f32 %v1202_v0, %v1201_v47  ;;  %v1112_v10 = vadd.f32 %v1111_v29, %v1110_v52  ;;  %v1136_v54 = vsel %vm552_vm0, %v3988_v2, 0.0  ;;  %v3993_v24 = vld [vmem:[#allocation20_spill] sm:$0xff] }
 0x165   : > { %v1191_v15 = vadd.f32 %v1190_v3, %v1189_v63  ;;  %v2069_v17 = vsel %vm2051_vm7, %v1163_v39, %v2068_v30  ;;  %v1124_v5 = vadd.f32 %v1123_v44, %v1122_v51  ;;  %v1137_v9 = vrot.slane %v1136_v54, 4 }
 0x166   : > { %v1204_v8 = vrot.slane %v1203_v13, 1  ;;  %v2070_v53 = vsel %vm2053_vm8, %v1177_v26, %v2069_v17  ;;  %v1113_v37 = vrot.slane %v1112_v10, 1  ;;  %v1150_v50 = vsel %vm552_vm0, %v3989_v36, 0.0 }
 0x167   : > { %v2071_v23 = vsel %vm2055_vm9, %v1191_v15, %v2070_v53  ;;  %v1125_v43 = vrot.slane %v1124_v5, 2  ;;  %v1138_v12 = vadd.f32 %v1137_v9, %v1136_v54  ;;  %v1151_v58 = vrot.slane %v1150_v50, 4 }
 0x168   : > { %v1205_v56 = vadd.f32 %v1204_v8, %v1203_v13  ;;  %v1114_v20 = vadd.f32 %v1113_v37, %v1112_v10  ;;  %v1164_v48 = vsel %vm552_vm0, %v3990_v34, 0.0  ;;  %v1178_v38 = vsel %vm552_vm0, %v3991_v31, 0.0 }
 0x169   : > { %v1126_v55 = vadd.f32 %v1125_v43, %v1124_v5  ;;  %v1139_v18 = vrot.slane %v1138_v12, 2  ;;  %v1152_v6 = vadd.f32 %v1151_v58, %v1150_v50  ;;  %v1165_v45 = vrot.slane %v1164_v48, 4 }
 0x16a   : > { %v2072_v14 = vsel %vm2057_vm10, %v1205_v56, %v2071_v23  ;;  %v1179_v11 = vrot.slane %v1178_v38, 4  ;;  %v1192_v49 = vsel %vm552_vm0, %v3992_v7, 0.0  ;;  %v1206_v47 = vsel %vm552_vm0, %v3993_v24, 0.0  ;;  %v3631_v7 = vld.sshfl [vmem:[#allocation1 + $0x20] sm:$0xff pattern:$0x73625140] }
 0x16b   : > { %2199 = vmatmul.f32.gmra.mxu0 %v2072_v14  ;;  %v1127_v52 = vrot.slane %v1126_v55, 1  ;;  %v1140_v33 = vadd.f32 %v1139_v18, %v1138_v12  ;;  %v1153_v62 = vrot.slane %v1152_v6, 2  ;;  %v1166_v63 = vadd.f32 %v1165_v45, %v1164_v48  ;;  %v3624_v48 = vld.sshfl [vmem:[#allocation1] sm:$0xff pattern:$0x73625140] }
 0x16c   : > { %v1180_v22 = vadd.f32 %v1179_v11, %v1178_v38  ;;  %v1193_v51 = vrot.slane %v1192_v49, 4  ;;  %v1207_v41 = vrot.slane %v1206_v47, 4  ;;  %v1661_v0 = vsel %vm552_vm0, %v3484_v25, 0.0 }
 0x16d   : > { %v1128_v59 = vadd.f32 %v1127_v52, %v1126_v55  ;;  %v1141_v29 = vrot.slane %v1140_v33, 1  ;;  %v1154_v39 = vadd.f32 %v1153_v62, %v1152_v6  ;;  %v1167_v3 = vrot.slane %v1166_v63, 2  ;;  %v3626_v6 = vld.sshfl [vmem:[#allocation1 + $0x8] sm:$0xff pattern:$0x73625140] }
 0x16e   : > { %v1181_v30 = vrot.slane %v1180_v22, 2  ;;  %v1194_v44 = vadd.f32 %v1193_v51, %v1192_v49  ;;  %v1208_v26 = vadd.f32 %v1207_v41, %v1206_v47  ;;  %v1662_v13 = vrot.slane %v1661_v0, 4  ;;  %v3634_v52 = vld.sshfl [vmem:[#allocation1 + $0x28] sm:$0xff pattern:$0x73625140] }
 0x16f   : > { %v1142_v10 = vadd.f32 %v1141_v29, %v1140_v33  ;;  %v1155_v2 = vrot.slane %v1154_v39, 1  ;;  %v1168_v54 = vadd.f32 %v1167_v3, %v1166_v63  ;;  %v2073_v15 = vsel %vm2045_vm4, %v1128_v59, %v1114_v20  ;;  %v3994_v33 = vld [vmem:[#allocation55_spill] sm:$0xff] }
 0x170   : > { %v1182_v17 = vadd.f32 %v1181_v30, %v1180_v22  ;;  %v1195_v5 = vrot.slane %v1194_v44, 2  ;;  %v1209_v9 = vrot.slane %v1208_v26, 2  ;;  %v1663_v8 = vadd.f32 %v1662_v13, %v1661_v0  ;;  %v3996_v0 = vld [vmem:[#allocation56_spill] sm:$0xff] }
 0x171   : > { %v1156_v53 = vadd.f32 %v1155_v2, %v1154_v39  ;;  %v1169_v37 = vrot.slane %v1168_v54, 1  ;;  %v2074_v25 = vsel %vm2047_vm5, %v1142_v10, %v2073_v15  ;;  %v1675_v36 = vsel %vm552_vm0, %v3491_v61, 0.0 }
 0x172   : > { %v1183_v50 = vrot.slane %v1182_v17, 1  ;;  %v1196_v23 = vadd.f32 %v1195_v5, %v1194_v44  ;;  %v1210_v43 = vadd.f32 %v1209_v9, %v1208_v26  ;;  %v1664_v12 = vrot.slane %v1663_v8, 2 }
 0x173   : > { %v1170_v58 = vadd.f32 %v1169_v37, %v1168_v54  ;;  %v2075_v56 = vsel %vm2049_vm6, %v1156_v53, %v2074_v25  ;;  %v1676_v34 = vrot.slane %v1675_v36, 4  ;;  %v1689_v20 = vsel %vm552_vm0, %v3514_v42, 0.0 }
 0x174   : > { %v1184_v31 = vadd.f32 %v1183_v50, %v1182_v17  ;;  %v1197_v38 = vrot.slane %v1196_v23, 1  ;;  %v1211_v55 = vrot.slane %v1210_v43, 1  ;;  %v1665_v18 = vadd.f32 %v1664_v12, %v1663_v8 }
 0x175   : > { %v2076_v61 = vsel %vm2051_vm7, %v1170_v58, %v2075_v56  ;;  %v1677_v45 = vadd.f32 %v1676_v34, %v1675_v36  ;;  %v1690_v14 = vrot.slane %v1689_v20, 4  ;;  %v1703_v11 = vsel %vm552_vm0, %v3519_v1, 0.0 }
 0x176   : > { %v1198_v49 = vadd.f32 %v1197_v38, %v1196_v23  ;;  %v1212_v24 = vadd.f32 %v1211_v55, %v1210_v43  ;;  %v2077_v42 = vsel %vm2053_vm8, %v1184_v31, %v2076_v61  ;;  %v1666_v47 = vrot.slane %v1665_v18, 1 }
 0x177   : > { %v3995_v62 = vrot.slane %v3994_v33, 4  ;;  %v1678_v63 = vrot.slane %v1677_v45, 2  ;;  %v1691_v22 = vadd.f32 %v1690_v14, %v1689_v20  ;;  %v1704_v51 = vrot.slane %v1703_v11, 4 }
 0x178   : > { %v1717_v41 = vsel %vm552_vm0, %v3539_v21, 0.0  ;;  %v3997_v1 = vrot.slane %v3996_v0, 6  ;;  %v2078_v59 = vsel %vm2055_vm9, %v1198_v49, %v2077_v42  ;;  %v1667_v29 = vadd.f32 %v1666_v47, %v1665_v18  ;;  %v3998_v47 = vld [vmem:[#allocation61_spill] sm:$0xff] }
 0x179   : > { %843 = vst [vmem:[#allocation1] ss:$4 sm:$0xff] %v3995_v62  ;;  %v1718_v39 = vrot.slane %v1717_v41, 4  ;;  %v1731_v3 = vsel %vm552_vm0, %v3548_v40, 0.0  ;;  %v2079_v30 = vsel %vm2057_vm10, %v1212_v24, %v2078_v59  ;;  %v1679_v44 = vadd.f32 %v1678_v63, %v1677_v45 }
 0x17a   : > { %846 = vst [vmem:[#allocation1 + $0x20] ss:$4 sm:$0xff] %v3997_v1  ;;  %v1692_v26 = vrot.slane %v1691_v22, 2  ;;  %v1705_v13 = vadd.f32 %v1704_v51, %v1703_v11  ;;  %2240 = vmatmul.f32.gmra.mxu1 %v2079_v30  ;;  %v1732_v2 = vrot.slane %v1731_v3, 4  ;;  %v1745_v21 = vsel %vm552_vm0, %v3564_v16, 0.0  ;;  %v3999_v51 = vld [vmem:[#allocation57_spill] sm:$0xff] }
 0x17b   : > { %v1719_v10 = vadd.f32 %v1718_v39, %v1717_v41  ;;  %v1759_v54 = vsel %vm552_vm0, %v3569_v27, 0.0  ;;  %v1680_v15 = vrot.slane %v1679_v44, 1  ;;  %v1746_v9 = vrot.slane %v1745_v21, 4 }
 0x17c   : > { %v1693_v17 = vadd.f32 %v1692_v26, %v1691_v22  ;;  %v1706_v5 = vrot.slane %v1705_v13, 2  ;;  %v1733_v40 = vadd.f32 %v1732_v2, %v1731_v3  ;;  %v1760_v53 = vrot.slane %v1759_v54, 4 }
 0x17d   : > { %v1720_v8 = vrot.slane %v1719_v10, 2  ;;  %v1668_v37 = vsel %vm552_vm0, %v3488_v28, 0.0  ;;  %v1681_v25 = vadd.f32 %v1680_v15, %v1679_v44  ;;  %v1747_v23 = vadd.f32 %v1746_v9, %v1745_v21 }
 0x17e   : > { %v1694_v36 = vrot.slane %v1693_v17, 1  ;;  %v1707_v50 = vadd.f32 %v1706_v5, %v1705_v13  ;;  %v1734_v12 = vrot.slane %v1733_v40, 2  ;;  %v1761_v58 = vadd.f32 %v1760_v53, %v1759_v54 }
 0x17f   : > { %v1721_v16 = vadd.f32 %v1720_v8, %v1719_v10  ;;  %v1669_v27 = vrot.slane %v1668_v37, 4  ;;  %v1748_v31 = vrot.slane %v1747_v23, 2  ;;  %v2136_v38 = vsel %vm2045_vm4, %v1681_v25, %v1667_v29 }
 0x180   : > { %v3652_v43 = vld.sshfl [vmem:[#allocation1] sm:$0xff pattern:$0x73625140]  ;;  %v3654_v56 = vld.sshfl [vmem:[#allocation1 + $0x8] sm:$0xff pattern:$0x73625140]  ;;  %v1695_v34 = vadd.f32 %v1694_v36, %v1693_v17  ;;  %v1735_v18 = vadd.f32 %v1734_v12, %v1733_v40 }
 0x181   : > { %v1708_v20 = vrot.slane %v1707_v50, 1  ;;  %v3657_v55 = vld.sshfl [vmem:[#allocation1 + $0x20] sm:$0xff pattern:$0x73625140]  ;;  %v1722_v28 = vrot.slane %v1721_v16, 1  ;;  %v1762_v61 = vrot.slane %v1761_v58, 2  ;;  %v1670_v45 = vadd.f32 %v1669_v27, %v1668_v37 }
 0x182   : > { %v3659_v14 = vld.sshfl [vmem:[#allocation1 + $0x28] sm:$0xff pattern:$0x73625140]  ;;  %v1749_v49 = vadd.f32 %v1748_v31, %v1747_v23  ;;  %v2137_v24 = vsel %vm2047_vm5, %v1695_v34, %v2136_v38  ;;  %v1682_v42 = vsel %vm552_vm0, %v3498_v57, 0.0  ;;  %849 = vst [vmem:[#allocation1] ss:$4 sm:$0xff] %v3998_v47 }
 0x183   : > { %v1709_v11 = vadd.f32 %v1708_v20, %v1707_v50  ;;  %v1723_v33 = vadd.f32 %v1722_v28, %v1721_v16  ;;  %v1736_v62 = vrot.slane %v1735_v18, 1  ;;  %v1763_v63 = vadd.f32 %v1762_v61, %v1761_v58  ;;  %v4001_v28 = vld [vmem:[#allocation21_spill] sm:$0xff] }
 0x184   : > { %v1671_v22 = vrot.slane %v1670_v45, 2  ;;  %v4000_v41 = vrot.slane %v3999_v51, 2  ;;  %v1750_v0 = vrot.slane %v1749_v49, 1  ;;  %v1683_v59 = vrot.slane %v1682_v42, 4 }
 0x185   : > { %v2138_v1 = vsel %vm2049_vm6, %v1709_v11, %v2137_v24  ;;  %v1696_v29 = vsel %vm552_vm0, %v3516_v32, 0.0  ;;  %v1737_v39 = vadd.f32 %v1736_v62, %v1735_v18  ;;  %v1764_v3 = vrot.slane %v1763_v63, 1 }
 0x186   : > { %852 = vst [vmem:[#allocation1 + $0x20] ss:$4 sm:$0xff] %v4000_v41  ;;  %v2139_v57 = vsel %vm2051_vm7, %v1723_v33, %v2138_v1  ;;  %v1672_v30 = vadd.f32 %v1671_v22, %v1670_v45  ;;  %v1751_v44 = vadd.f32 %v1750_v0, %v1749_v49  ;;  %v1684_v26 = vadd.f32 %v1683_v59, %v1682_v42  ;;  %v4002_v49 = vld [vmem:[#allocation58_spill] sm:$0xff] }
 0x187   : > { %v1697_v13 = vrot.slane %v1696_v29, 4  ;;  %v1710_v10 = vsel %vm552_vm0, %v3521_v19, 0.0  ;;  %v1765_v2 = vadd.f32 %v1764_v3, %v1763_v63  ;;  %v2140_v21 = vsel %vm2053_vm8, %v1737_v39, %v2139_v57  ;;  %v4004_v63 = vld [vmem:[#allocation59_spill] sm:$0xff] }
 0x188   : > { %v1673_v54 = vrot.slane %v1672_v30, 1  ;;  %v1711_v15 = vrot.slane %v1710_v10, 4  ;;  %v2141_v17 = vsel %vm2055_vm9, %v1751_v44, %v2140_v21  ;;  %v1685_v5 = vrot.slane %v1684_v26, 2 }
 0x189   : > { %v1698_v32 = vadd.f32 %v1697_v13, %v1696_v29  ;;  %v1724_v9 = vsel %vm552_vm0, %v3542_v35, 0.0  ;;  %v2142_v8 = vsel %vm2057_vm10, %v1765_v2, %v2141_v17  ;;  %v3678_v25 = vld.sshfl [vmem:[#allocation1] sm:$0xff pattern:$0x73625140]  ;;  %v1738_v50 = vsel %vm552_vm0, %v3550_v46, 0.0  ;;  %v4006_v2 = vld [vmem:[#allocation23_spill] sm:$0xff] }
 0x18a   : > { %v1674_v40 = vadd.f32 %v1673_v54, %v1672_v30  ;;  %v1712_v53 = vadd.f32 %v1711_v15, %v1710_v10  ;;  %v1725_v37 = vrot.slane %v1724_v9, 4  ;;  %2214 = vmatmul.f32.gmra.mxu2 %v2142_v8  ;;  %v1686_v19 = vadd.f32 %v1685_v5, %v1684_v26  ;;  %v3684_v16 = vld.sshfl [vmem:[#allocation1 + $0x8] sm:$0xff pattern:$0x73625140] }
 0x18b   : > { %v1699_v36 = vrot.slane %v1698_v32, 2  ;;  %v1752_v23 = vsel %vm552_vm0, %v3572_v4, 0.0  ;;  %v1739_v58 = vrot.slane %v1738_v50, 4  ;;  %v1766_v38 = vsel %vm552_vm0, %v3574_v60, 0.0 }
 0x18c   : > { %v1713_v12 = vrot.slane %v1712_v53, 2  ;;  %v1726_v35 = vadd.f32 %v1725_v37, %v1724_v9  ;;  %v1753_v27 = vrot.slane %v1752_v23, 4  ;;  %v1687_v20 = vrot.slane %v1686_v19, 1 }
 0x18d   : > { %v3686_v34 = vld.sshfl [vmem:[#allocation1 + $0x20] sm:$0xff pattern:$0x73625140]  ;;  %v1700_v31 = vadd.f32 %v1699_v36, %v1698_v32  ;;  %v1213_v18 = vsel %vm552_vm0, %v4001_v28, 0.0  ;;  %v1740_v45 = vadd.f32 %v1739_v58, %v1738_v50  ;;  %v4003_v24 = vrot.slane %v4002_v49, 4  ;;  %v4008_v58 = vld [vmem:[#allocation27_spill] sm:$0xff] }
 0x18e   : > { %v3692_v46 = vld.sshfl [vmem:[#allocation1 + $0x28] sm:$0xff pattern:$0x73625140]  ;;  %v1714_v61 = vadd.f32 %v1713_v12, %v1712_v53  ;;  %v1727_v4 = vrot.slane %v1726_v35, 2  ;;  %v1754_v11 = vadd.f32 %v1753_v27, %v1752_v23  ;;  %v1688_v42 = vadd.f32 %v1687_v20, %v1686_v19 }
 0x18f   : > { %855 = vst [vmem:[#allocation1] ss:$4 sm:$0xff] %v4003_v24  ;;  %v1701_v47 = vrot.slane %v1700_v31, 1  ;;  %v1767_v33 = vrot.slane %v1766_v38, 4  ;;  %v1214_v62 = vrot.slane %v1213_v18, 4  ;;  %v4005_v22 = vrot.slane %v4004_v63, 6 }
 0x190   : > { %v1715_v60 = vrot.slane %v1714_v61, 1  ;;  %v1728_v51 = vadd.f32 %v1727_v4, %v1726_v35  ;;  %v1741_v41 = vrot.slane %v1740_v45, 2  ;;  %v1755_v0 = vrot.slane %v1754_v11, 2  ;;  %v4009_v28 = vld [vmem:[#allocation29_spill] sm:$0xff] }
 0x191   : > { %858 = vst [vmem:[#allocation1 + $0x20] ss:$4 sm:$0xff] %v4005_v22  ;;  %v1702_v1 = vadd.f32 %v1701_v47, %v1700_v31  ;;  %v1768_v59 = vadd.f32 %v1767_v33, %v1766_v38  ;;  %v2143_v29 = vsel %vm2045_vm4, %v1688_v42, %v1674_v40  ;;  %v1215_v39 = vadd.f32 %v1214_v62, %v1213_v18  ;;  %v4007_v40 = vld [vmem:[#allocation25_spill] sm:$0xff]  ;;  %v4010_v47 = vld [vmem:[#allocation31_spill] sm:$0xff] }
 0x192   : > { %v1716_v3 = vadd.f32 %v1715_v60, %v1714_v61  ;;  %v1729_v57 = vrot.slane %v1728_v51, 1  ;;  %v1742_v30 = vadd.f32 %v1741_v41, %v1740_v45  ;;  %v1756_v44 = vadd.f32 %v1755_v0, %v1754_v11  ;;  %v4011_v60 = vld [vmem:[#allocation33_spill] sm:$0xff] }
 0x193   : > { %v1769_v26 = vrot.slane %v1768_v59, 2  ;;  %v2144_v13 = vsel %vm2047_vm5, %v1702_v1, %v2143_v29  ;;  %v1216_v10 = vrot.slane %v1215_v39, 2  ;;  %v1227_v21 = vsel %vm552_vm0, %v4006_v2, 0.0 }
 0x194   : > { %v1730_v54 = vadd.f32 %v1729_v57, %v1728_v51  ;;  %v1743_v15 = vrot.slane %v1742_v30, 1  ;;  %v1757_v17 = vrot.slane %v1756_v44, 1  ;;  %v2145_v5 = vsel %vm2049_vm6, %v1716_v3, %v2144_v13  ;;  %v4012_v3 = vld [vmem:[#allocation35_spill] sm:$0xff] }
 0x195   : > { %v1770_v32 = vadd.f32 %v1769_v26, %v1768_v59  ;;  %v1217_v9 = vadd.f32 %v1216_v10, %v1215_v39  ;;  %v1228_v8 = vrot.slane %v1227_v21, 4  ;;  %v1241_v53 = vsel %vm552_vm0, %v4007_v40, 0.0 }
 0x196   : > { %v1744_v37 = vadd.f32 %v1743_v15, %v1742_v30  ;;  %v1758_v19 = vadd.f32 %v1757_v17, %v1756_v44  ;;  %v2146_v36 = vsel %vm2051_vm7, %v1730_v54, %v2145_v5  ;;  %v1242_v50 = vrot.slane %v1241_v53, 4  ;;  %v4013_v30 = vld [vmem:[#allocation22_spill] sm:$0xff] }
 0x197   : > { %v1771_v23 = vrot.slane %v1770_v32, 1  ;;  %v1218_v12 = vrot.slane %v1217_v9, 1  ;;  %v1229_v35 = vadd.f32 %v1228_v8, %v1227_v21  ;;  %v1255_v27 = vsel %vm552_vm0, %v4008_v58, 0.0 }
 0x198   : > { %v2147_v20 = vsel %vm2053_vm8, %v1744_v37, %v2146_v36  ;;  %v1243_v31 = vadd.f32 %v1242_v50, %v1241_v53  ;;  %v1256_v38 = vrot.slane %v1255_v27, 4  ;;  %v1269_v18 = vsel %vm552_vm0, %v4009_v28, 0.0 }
 0x199   : > { %v1772_v61 = vadd.f32 %v1771_v23, %v1770_v32  ;;  %v2148_v4 = vsel %vm2055_vm9, %v1758_v19, %v2147_v20  ;;  %v1219_v45 = vadd.f32 %v1218_v12, %v1217_v9  ;;  %v1230_v11 = vrot.slane %v1229_v35, 2  ;;  %v4014_v20 = vld [vmem:[#allocation24_spill] sm:$0xff] }
 0x19a   : > { %v1244_v49 = vrot.slane %v1243_v31, 2  ;;  %v1257_v24 = vadd.f32 %v1256_v38, %v1255_v27  ;;  %v1270_v42 = vrot.slane %v1269_v18, 4  ;;  %v1283_v33 = vsel %vm552_vm0, %v4010_v47, 0.0 }
 0x19b   : > { %v2149_v62 = vsel %vm2057_vm10, %v1772_v61, %v2148_v4  ;;  %v1231_v63 = vadd.f32 %v1230_v11, %v1229_v35  ;;  %v1284_v22 = vrot.slane %v1283_v33, 4  ;;  %v1297_v51 = vsel %vm552_vm0, %v4011_v60, 0.0 }
 0x19c   : > { %2255 = vmatmul.f32.gmra.mxu3 %v2149_v62  ;;  %v1245_v41 = vadd.f32 %v1244_v49, %v1243_v31  ;;  %v1258_v0 = vrot.slane %v1257_v24, 2  ;;  %v1271_v1 = vadd.f32 %v1270_v42, %v1269_v18  ;;  %v1298_v59 = vrot.slane %v1297_v51, 4  ;;  %v4015_v49 = vld [vmem:[#allocation26_spill] sm:$0xff] }
 0x19d   : > { %v1232_v29 = vrot.slane %v1231_v63, 1  ;;  %v1285_v39 = vadd.f32 %v1284_v22, %v1283_v33  ;;  %v1311_v57 = vsel %vm552_vm0, %v4012_v3, 0.0  ;;  %v1220_v44 = vsel %vm552_vm0, %v4013_v30, 0.0 }
 0x19e   : > { %v1246_v26 = vrot.slane %v1245_v41, 1  ;;  %v1259_v13 = vadd.f32 %v1258_v0, %v1257_v24  ;;  %v1272_v10 = vrot.slane %v1271_v1, 2  ;;  %v1299_v2 = vadd.f32 %v1298_v59, %v1297_v51  ;;  %v4016_v51 = vld [vmem:[#allocation28_spill] sm:$0xff] }
 0x19f   : > { %v1233_v21 = vadd.f32 %v1232_v29, %v1231_v63  ;;  %v1286_v54 = vrot.slane %v1285_v39, 2  ;;  %v1312_v15 = vrot.slane %v1311_v57, 4  ;;  %v1221_v17 = vrot.slane %v1220_v44, 4 }
 0x1a0   : > { %v1247_v5 = vadd.f32 %v1246_v26, %v1245_v41  ;;  %v1260_v32 = vrot.slane %v1259_v13, 1  ;;  %v1273_v9 = vadd.f32 %v1272_v10, %v1271_v1  ;;  %v1300_v8 = vrot.slane %v1299_v2, 2 }
 0x1a1   : > { %v1287_v40 = vadd.f32 %v1286_v54, %v1285_v39  ;;  %v1313_v53 = vadd.f32 %v1312_v15, %v1311_v57  ;;  %v2080_v37 = vsel %vm2045_vm4, %v1233_v21, %v1219_v45  ;;  %v1222_v19 = vadd.f32 %v1221_v17, %v1220_v44  ;;  %v4017_v57 = vld [vmem:[#allocation30_spill] sm:$0xff]  ;;  %v4018_v44 = vld [vmem:[#allocation32_spill] sm:$0xff] }
 0x1a2   : > { %v1261_v36 = vadd.f32 %v1260_v32, %v1259_v13  ;;  %v1274_v50 = vrot.slane %v1273_v9, 1  ;;  %v1301_v23 = vadd.f32 %v1300_v8, %v1299_v2  ;;  %v2081_v12 = vsel %vm2047_vm5, %v1247_v5, %v2080_v37  ;;  %v4019_v17 = vld [vmem:[#allocation34_spill] sm:$0xff]  ;;  %v4020_v32 = vld [vmem:[#allocation36_spill] sm:$0xff] }
 0x1a3   : > { %v1288_v35 = vrot.slane %v1287_v40, 1  ;;  %v1314_v58 = vrot.slane %v1313_v53, 2  ;;  %v1223_v27 = vrot.slane %v1222_v19, 2  ;;  %v1234_v31 = vsel %vm552_vm0, %v4014_v20, 0.0 }
 0x1a4   : > { %v1275_v38 = vadd.f32 %v1274_v50, %v1273_v9  ;;  %v1302_v28 = vrot.slane %v1301_v23, 1  ;;  %v2082_v18 = vsel %vm2049_vm6, %v1261_v36, %v2081_v12  ;;  %v1235_v61 = vrot.slane %v1234_v31, 4 }
 0x1a5   : > { %v1289_v4 = vadd.f32 %v1288_v35, %v1287_v40  ;;  %v1315_v11 = vadd.f32 %v1314_v58, %v1313_v53  ;;  %v1224_v45 = vadd.f32 %v1223_v27, %v1222_v19  ;;  %v1248_v24 = vsel %vm552_vm0, %v4015_v49, 0.0 }
 0x1a6   : > { %v1303_v42 = vadd.f32 %v1302_v28, %v1301_v23  ;;  %v2083_v47 = vsel %vm2051_vm7, %v1275_v38, %v2082_v18  ;;  %v1236_v33 = vadd.f32 %v1235_v61, %v1234_v31  ;;  %v1249_v62 = vrot.slane %v1248_v24, 4 }
 0x1a7   : > { %v1316_v63 = vrot.slane %v1315_v11, 1  ;;  %v2084_v22 = vsel %vm2053_vm8, %v1289_v4, %v2083_v47  ;;  %v1225_v60 = vrot.slane %v1224_v45, 1  ;;  %v1262_v41 = vsel %vm552_vm0, %v4016_v51, 0.0 }
 0x1a8   : > { %v2085_v0 = vsel %vm2055_vm9, %v1303_v42, %v2084_v22  ;;  %v1237_v1 = vrot.slane %v1236_v33, 2  ;;  %v1250_v59 = vadd.f32 %v1249_v62, %v1248_v24  ;;  %v1263_v29 = vrot.slane %v1262_v41, 4 }
 0x1a9   : > { %v1317_v39 = vadd.f32 %v1316_v63, %v1315_v11  ;;  %v1226_v3 = vadd.f32 %v1225_v60, %v1224_v45  ;;  %v1276_v30 = vsel %vm552_vm0, %v4017_v57, 0.0  ;;  %v1290_v26 = vsel %vm552_vm0, %v4018_v44, 0.0 }
 0x1aa   : > { %v1238_v13 = vadd.f32 %v1237_v1, %v1236_v33  ;;  %v1251_v10 = vrot.slane %v1250_v59, 2  ;;  %v1264_v2 = vadd.f32 %v1263_v29, %v1262_v41  ;;  %v1277_v21 = vrot.slane %v1276_v30, 4 }
 0x1ab   : > { %v2086_v54 = vsel %vm2057_vm10, %v1317_v39, %v2085_v0  ;;  %v1291_v15 = vrot.slane %v1290_v26, 4  ;;  %v1304_v5 = vsel %vm552_vm0, %v4019_v17, 0.0  ;;  %v1318_v9 = vsel %vm552_vm0, %v4020_v32, 0.0 }
 0x1ac   : > { %2202 = vmatmul.f32.gmra.mxu0 %v2086_v54  ;;  %v1239_v8 = vrot.slane %v1238_v13, 1  ;;  %v1252_v40 = vadd.f32 %v1251_v10, %v1250_v59  ;;  %v1265_v53 = vrot.slane %v1264_v2, 2  ;;  %v1278_v37 = vadd.f32 %v1277_v21, %v1276_v30  ;;  %v856_v21 = vld.sshfl [vmem:[#allocation1] sm:$0xff pattern:$0x73625140] }
 0x1ad   : > { %v1292_v19 = vadd.f32 %v1291_v15, %v1290_v26  ;;  %v1305_v36 = vrot.slane %v1304_v5, 4  ;;  %v1319_v50 = vrot.slane %v1318_v9, 4  ;;  %v1773_v23 = vsel %vm552_vm0, %v3624_v48, 0.0  ;;  %v859_v15 = vld.sshfl [vmem:[#allocation1 + $0x20] sm:$0xff pattern:$0x73625140] }
 0x1ae   : > { %v1240_v12 = vadd.f32 %v1239_v8, %v1238_v13  ;;  %v1253_v35 = vrot.slane %v1252_v40, 1  ;;  %v1266_v58 = vadd.f32 %v1265_v53, %v1264_v2  ;;  %v1279_v27 = vrot.slane %v1278_v37, 2 }
 0x1af   : > { %v1293_v20 = vrot.slane %v1292_v19, 2  ;;  %v1306_v31 = vadd.f32 %v1305_v36, %v1304_v5  ;;  %v1320_v38 = vadd.f32 %v1319_v50, %v1318_v9  ;;  %v1774_v28 = vrot.slane %v1773_v23, 4 }
 0x1b0   : > { %v1254_v18 = vadd.f32 %v1253_v35, %v1252_v40  ;;  %v1267_v61 = vrot.slane %v1266_v58, 1  ;;  %v1280_v4 = vadd.f32 %v1279_v27, %v1278_v37  ;;  %v2087_v11 = vsel %vm2045_vm4, %v1240_v12, %v1226_v3 }
 0x1b1   : > { %v1294_v45 = vadd.f32 %v1293_v20, %v1292_v19  ;;  %v1307_v49 = vrot.slane %v1306_v31, 2  ;;  %v1321_v24 = vrot.slane %v1320_v38, 2  ;;  %v1775_v42 = vadd.f32 %v1774_v28, %v1773_v23 }
 0x1b2   : > { %v1268_v47 = vadd.f32 %v1267_v61, %v1266_v58  ;;  %v1281_v33 = vrot.slane %v1280_v4, 1  ;;  %v2088_v48 = vsel %vm2047_vm5, %v1254_v18, %v2087_v11  ;;  %v1787_v62 = vsel %vm552_vm0, %v3631_v7, 0.0 }
 0x1b3   : > { %v1295_v63 = vrot.slane %v1294_v45, 1  ;;  %v1308_v22 = vadd.f32 %v1307_v49, %v1306_v31  ;;  %v1322_v60 = vadd.f32 %v1321_v24, %v1320_v38  ;;  %v1776_v51 = vrot.slane %v1775_v42, 2 }
 0x1b4   : > { %v1282_v41 = vadd.f32 %v1281_v33, %v1280_v4  ;;  %v2089_v0 = vsel %vm2049_vm6, %v1268_v47, %v2088_v48  ;;  %v1788_v1 = vrot.slane %v1787_v62, 4  ;;  %v1801_v59 = vsel %vm552_vm0, %v3652_v43, 0.0 }
 0x1b5   : > { %v1296_v29 = vadd.f32 %v1295_v63, %v1294_v45  ;;  %v1309_v39 = vrot.slane %v1308_v22, 1  ;;  %v1323_v3 = vrot.slane %v1322_v60, 1  ;;  %v1777_v57 = vadd.f32 %v1776_v51, %v1775_v42 }
 0x1b6   : > { %v2090_v30 = vsel %vm2051_vm7, %v1282_v41, %v2089_v0  ;;  %v1789_v44 = vadd.f32 %v1788_v1, %v1787_v62  ;;  %v1802_v26 = vrot.slane %v1801_v59, 4  ;;  %v1815_v7 = vsel %vm552_vm0, %v3657_v55, 0.0 }
 0x1b7   : > { %v1310_v13 = vadd.f32 %v1309_v39, %v1308_v22  ;;  %v1324_v10 = vadd.f32 %v1323_v3, %v1322_v60  ;;  %v2091_v2 = vsel %vm2053_vm8, %v1296_v29, %v2090_v30  ;;  %v1778_v54 = vrot.slane %v1777_v57, 1 }
 0x1b8   : > { %v1790_v17 = vrot.slane %v1789_v44, 2  ;;  %v1803_v43 = vadd.f32 %v1802_v26, %v1801_v59  ;;  %v1816_v5 = vrot.slane %v1815_v7, 4  ;;  %v1829_v32 = vsel %vm552_vm0, %v3678_v25, 0.0 }
 0x1b9   : > { %v2092_v9 = vsel %vm2055_vm9, %v1310_v13, %v2091_v2  ;;  %v1779_v8 = vadd.f32 %v1778_v54, %v1777_v57  ;;  %v1830_v40 = vrot.slane %v1829_v32, 4  ;;  %v1843_v55 = vsel %vm552_vm0, %v3686_v34, 0.0 }
 0x1ba   : > { %v2093_v53 = vsel %vm2057_vm10, %v1324_v10, %v2092_v9  ;;  %v1791_v37 = vadd.f32 %v1790_v17, %v1789_v44  ;;  %v1804_v19 = vrot.slane %v1803_v43, 2  ;;  %v1817_v36 = vadd.f32 %v1816_v5, %v1815_v7  ;;  %v857_v5 = vld.sshfl [vmem:[#allocation1 + $0x8] sm:$0xff pattern:$0x73625140] }
 0x1bb   : > { %2243 = vmatmul.f32.gmra.mxu1 %v2093_v53  ;;  %v1831_v50 = vadd.f32 %v1830_v40, %v1829_v32  ;;  %v1844_v23 = vrot.slane %v1843_v55, 4  ;;  %v1857_v12 = vsel %vm552_vm0, %v856_v21, 0.0  ;;  %v1871_v35 = vsel %vm552_vm0, %v859_v15, 0.0 }
 0x1bc   : > { %v1792_v25 = vrot.slane %v1791_v37, 1  ;;  %v1805_v58 = vadd.f32 %v1804_v19, %v1803_v43  ;;  %v1818_v27 = vrot.slane %v1817_v36, 2  ;;  %v1858_v20 = vrot.slane %v1857_v12, 4 }
 0x1bd   : > { %v1832_v31 = vrot.slane %v1831_v50, 2  ;;  %v1845_v38 = vadd.f32 %v1844_v23, %v1843_v55  ;;  %v1872_v28 = vrot.slane %v1871_v35, 4  ;;  %v1780_v34 = vsel %vm552_vm0, %v3626_v6, 0.0 }
 0x1be   : > { %v1793_v18 = vadd.f32 %v1792_v25, %v1791_v37  ;;  %v1806_v61 = vrot.slane %v1805_v58, 1  ;;  %v1819_v4 = vadd.f32 %v1818_v27, %v1817_v36  ;;  %v1859_v11 = vadd.f32 %v1858_v20, %v1857_v12  ;;  %v860_v37 = vld.sshfl [vmem:[#allocation1 + $0x28] sm:$0xff pattern:$0x73625140] }
 0x1bf   : > { %v1833_v45 = vadd.f32 %v1832_v31, %v1831_v50  ;;  %v1846_v49 = vrot.slane %v1845_v38, 2  ;;  %v1873_v24 = vadd.f32 %v1872_v28, %v1871_v35  ;;  %v1781_v42 = vrot.slane %v1780_v34, 4  ;;  %v4021_v28 = vld [vmem:[#allocation37_spill] sm:$0xff] }
 0x1c0   : > { %v1807_v47 = vadd.f32 %v1806_v61, %v1805_v58  ;;  %v1820_v33 = vrot.slane %v1819_v4, 1  ;;  %v1860_v48 = vrot.slane %v1859_v11, 2  ;;  %v2150_v62 = vsel %vm2045_vm4, %v1793_v18, %v1779_v8 }
 0x1c1   : > { %v1834_v63 = vrot.slane %v1833_v45, 1  ;;  %v1847_v22 = vadd.f32 %v1846_v49, %v1845_v38  ;;  %v1874_v60 = vrot.slane %v1873_v24, 2  ;;  %v1782_v51 = vadd.f32 %v1781_v42, %v1780_v34 }
 0x1c2   : > { %v1821_v41 = vadd.f32 %v1820_v33, %v1819_v4  ;;  %v1861_v0 = vadd.f32 %v1860_v48, %v1859_v11  ;;  %v2151_v6 = vsel %vm2047_vm5, %v1807_v47, %v2150_v62  ;;  %v1794_v1 = vsel %vm552_vm0, %v3634_v52, 0.0 }
 0x1c3   : > { %v1835_v59 = vadd.f32 %v1834_v63, %v1833_v45  ;;  %v1848_v29 = vrot.slane %v1847_v22, 1  ;;  %v1875_v39 = vadd.f32 %v1874_v60, %v1873_v24  ;;  %v1783_v3 = vrot.slane %v1782_v51, 2 }
 0x1c4   : > { %v1862_v57 = vrot.slane %v1861_v0, 1  ;;  %v2152_v30 = vsel %vm2049_vm6, %v1821_v41, %v2151_v6  ;;  %v1795_v44 = vrot.slane %v1794_v1, 4  ;;  %v1808_v26 = vsel %vm552_vm0, %v3654_v56, 0.0 }
 0x1c5   : > { %v1849_v7 = vadd.f32 %v1848_v29, %v1847_v22  ;;  %v1876_v13 = vrot.slane %v1875_v39, 1  ;;  %v2153_v10 = vsel %vm2051_vm7, %v1835_v59, %v2152_v30  ;;  %v1784_v2 = vadd.f32 %v1783_v3, %v1782_v51 }
 0x1c6   : > { %v1863_v21 = vadd.f32 %v1862_v57, %v1861_v0  ;;  %v1796_v54 = vadd.f32 %v1795_v44, %v1794_v1  ;;  %v1809_v15 = vrot.slane %v1808_v26, 4  ;;  %v1822_v52 = vsel %vm552_vm0, %v3659_v14, 0.0 }
 0x1c7   : > { %v1877_v17 = vadd.f32 %v1876_v13, %v1875_v39  ;;  %v2154_v43 = vsel %vm2053_vm8, %v1849_v7, %v2153_v10  ;;  %v1785_v32 = vrot.slane %v1784_v2, 1  ;;  %v1823_v9 = vrot.slane %v1822_v52, 4  ;;  %v4022_v39 = vld [vmem:[#allocation39_spill] sm:$0xff] }
 0x1c8   : > { %v2155_v8 = vsel %vm2055_vm9, %v1863_v21, %v2154_v43  ;;  %v1797_v56 = vrot.slane %v1796_v54, 2  ;;  %v1810_v40 = vadd.f32 %v1809_v15, %v1808_v26  ;;  %v1836_v55 = vsel %vm552_vm0, %v3684_v16, 0.0 }
 0x1c9   : > { %v2156_v53 = vsel %vm2057_vm10, %v1877_v17, %v2155_v8  ;;  %v1786_v19 = vadd.f32 %v1785_v32, %v1784_v2  ;;  %v1824_v36 = vadd.f32 %v1823_v9, %v1822_v52  ;;  %v1837_v50 = vrot.slane %v1836_v55, 4  ;;  %v4023_v2 = vld [vmem:[#allocation41_spill] sm:$0xff]  ;;  %v4024_v9 = vld [vmem:[#allocation43_spill] sm:$0xff] }
 0x1ca   : > { %2217 = vmatmul.f32.gmra.mxu2 %v2156_v53  ;;  %v1798_v14 = vadd.f32 %v1797_v56, %v1796_v54  ;;  %v1811_v23 = vrot.slane %v1810_v40, 2  ;;  %v1850_v12 = vsel %vm552_vm0, %v3692_v46, 0.0  ;;  %v1864_v35 = vsel %vm552_vm0, %v857_v5, 0.0  ;;  %v4025_v53 = vld [vmem:[#allocation45_spill] sm:$0xff] }
 0x1cb   : > { %v1825_v25 = vrot.slane %v1824_v36, 2  ;;  %v1838_v58 = vadd.f32 %v1837_v50, %v1836_v55  ;;  %v1851_v27 = vrot.slane %v1850_v12, 4  ;;  %v1865_v20 = vrot.slane %v1864_v35, 4 }
 0x1cc   : > { %v1799_v31 = vrot.slane %v1798_v14, 1  ;;  %v1812_v16 = vadd.f32 %v1811_v23, %v1810_v40  ;;  %v1878_v38 = vsel %vm552_vm0, %v860_v37, 0.0  ;;  %v1325_v34 = vsel %vm552_vm0, %v4021_v28, 0.0 }
 0x1cd   : > { %v1826_v18 = vadd.f32 %v1825_v25, %v1824_v36  ;;  %v1839_v61 = vrot.slane %v1838_v58, 2  ;;  %v1852_v4 = vadd.f32 %v1851_v27, %v1850_v12  ;;  %v1866_v11 = vadd.f32 %v1865_v20, %v1864_v35  ;;  %v4026_v25 = vld [vmem:[#allocation47_spill] sm:$0xff] }
 0x1ce   : > { %v1800_v45 = vadd.f32 %v1799_v31, %v1798_v14  ;;  %v1813_v49 = vrot.slane %v1812_v16, 1  ;;  %v1879_v46 = vrot.slane %v1878_v38, 4  ;;  %v1326_v24 = vrot.slane %v1325_v34, 4 }
 0x1cf   : > { %v1827_v42 = vrot.slane %v1826_v18, 1  ;;  %v1840_v47 = vadd.f32 %v1839_v61, %v1838_v58  ;;  %v1853_v33 = vrot.slane %v1852_v4, 2  ;;  %v1867_v48 = vrot.slane %v1866_v11, 2 }
 0x1d0   : > { %v1814_v62 = vadd.f32 %v1813_v49, %v1812_v16  ;;  %v1880_v63 = vadd.f32 %v1879_v46, %v1878_v38  ;;  %v2157_v22 = vsel %vm2045_vm4, %v1800_v45, %v1786_v19  ;;  %v1327_v60 = vadd.f32 %v1326_v24, %v1325_v34  ;;  %v4027_v16 = vld [vmem:[#allocation49_spill] sm:$0xff]  ;;  %v4028_v45 = vld [vmem:[#allocation51_spill] sm:$0xff]  ;;  %v4029_v46 = vld [vmem:[#allocation38_spill] sm:$0xff] }
 0x1d1   : > { %v1828_v51 = vadd.f32 %v1827_v42, %v1826_v18  ;;  %v1841_v41 = vrot.slane %v1840_v47, 1  ;;  %v1854_v0 = vadd.f32 %v1853_v33, %v1852_v4  ;;  %v1868_v6 = vadd.f32 %v1867_v48, %v1866_v11 }
 0x1d2   : > { %v1881_v1 = vrot.slane %v1880_v63, 2  ;;  %v2158_v59 = vsel %vm2047_vm5, %v1814_v62, %v2157_v22  ;;  %v1328_v29 = vrot.slane %v1327_v60, 2  ;;  %v1339_v3 = vsel %vm552_vm0, %v4022_v39, 0.0 }
 0x1d3   : > { %v1842_v57 = vadd.f32 %v1841_v41, %v1840_v47  ;;  %v1855_v30 = vrot.slane %v1854_v0, 1  ;;  %v1869_v44 = vrot.slane %v1868_v6, 1  ;;  %v2159_v26 = vsel %vm2049_vm6, %v1828_v51, %v2158_v59 }
 0x1d4   : > { %v1882_v7 = vadd.f32 %v1881_v1, %v1880_v63  ;;  %v1329_v13 = vadd.f32 %v1328_v29, %v1327_v60  ;;  %v1340_v10 = vrot.slane %v1339_v3, 4  ;;  %v1353_v21 = vsel %vm552_vm0, %v4023_v2, 0.0 }
 0x1d5   : > { %v1856_v54 = vadd.f32 %v1855_v30, %v1854_v0  ;;  %v1870_v15 = vadd.f32 %v1869_v44, %v1868_v6  ;;  %v2160_v52 = vsel %vm2051_vm7, %v1842_v57, %v2159_v26  ;;  %v1354_v17 = vrot.slane %v1353_v21, 4 }
 0x1d6   : > { %v1883_v43 = vrot.slane %v1882_v7, 1  ;;  %v1330_v5 = vrot.slane %v1329_v13, 1  ;;  %v1341_v32 = vadd.f32 %v1340_v10, %v1339_v3  ;;  %v1367_v8 = vsel %vm552_vm0, %v4024_v9, 0.0  ;;  %v4030_v10 = vld [vmem:[#allocation40_spill] sm:$0xff] }
 0x1d7   : > { %v2161_v56 = vsel %vm2053_vm8, %v1856_v54, %v2160_v52  ;;  %v1355_v40 = vadd.f32 %v1354_v17, %v1353_v21  ;;  %v1368_v55 = vrot.slane %v1367_v8, 4  ;;  %v1381_v37 = vsel %vm552_vm0, %v4025_v53, 0.0  ;;  %v2209_v17 = vpop.f32.mrf.mxu2 }
 0x1d8   : > { %v1884_v19 = vadd.f32 %v1883_v43, %v1882_v7  ;;  %v2162_v36 = vsel %vm2055_vm9, %v1870_v15, %v2161_v56  ;;  %v1331_v50 = vadd.f32 %v1330_v5, %v1329_v13  ;;  %v1342_v14 = vrot.slane %v1341_v32, 2  ;;  %v2250_v43 = vpop.f32.mrf.mxu3 }
 0x1d9   : > { %v1356_v23 = vrot.slane %v1355_v40, 2  ;;  %v1369_v12 = vadd.f32 %v1368_v55, %v1367_v8  ;;  %v1382_v35 = vrot.slane %v1381_v37, 4  ;;  %v1395_v58 = vsel %vm552_vm0, %v4026_v25, 0.0  ;;  %v4031_v8 = vld [vmem:[#allocation42_spill] sm:$0xff] }
 0x1da   : > { %v2163_v27 = vsel %vm2057_vm10, %v1884_v19, %v2162_v36  ;;  %v1343_v20 = vadd.f32 %v1342_v14, %v1341_v32  ;;  %v1396_v31 = vrot.slane %v1395_v58, 4  ;;  %v1409_v38 = vsel %vm552_vm0, %v4027_v16, 0.0  ;;  %v4032_v14 = vld [vmem:[#allocation44_spill] sm:$0xff] }
 0x1db   : > { %2258 = vmatmul.f32.gmra.mxu3 %v2163_v27  ;;  %v1357_v28 = vadd.f32 %v1356_v23, %v1355_v40  ;;  %v1370_v34 = vrot.slane %v1369_v12, 2  ;;  %v1383_v18 = vadd.f32 %v1382_v35, %v1381_v37  ;;  %v1410_v61 = vrot.slane %v1409_v38, 4 }
 0x1dc   : > { %v1344_v4 = vrot.slane %v1343_v20, 1  ;;  %v1397_v11 = vadd.f32 %v1396_v31, %v1395_v58  ;;  %v1423_v49 = vsel %vm552_vm0, %v4028_v45, 0.0  ;;  %v1332_v24 = vsel %vm552_vm0, %v4029_v46, 0.0  ;;  %v4033_v31 = vld [vmem:[#allocation46_spill] sm:$0xff]  ;;  %v2238_v45 = vpop.f32.mrf.mxu1 }
 0x1dd   : > { %v1358_v42 = vrot.slane %v1357_v28, 1  ;;  %v1371_v47 = vadd.f32 %v1370_v34, %v1369_v12  ;;  %v1384_v33 = vrot.slane %v1383_v18, 2  ;;  %v1411_v48 = vadd.f32 %v1410_v61, %v1409_v38  ;;  %v4034_v38 = vld [vmem:[#allocation48_spill] sm:$0xff] }
 0x1de   : > { %v1345_v62 = vadd.f32 %v1344_v4, %v1343_v20  ;;  %v1398_v63 = vrot.slane %v1397_v11, 2  ;;  %v1424_v22 = vrot.slane %v1423_v49, 4  ;;  %v1333_v60 = vrot.slane %v1332_v24, 4 }
 0x1df   : > { %v1359_v51 = vadd.f32 %v1358_v42, %v1357_v28  ;;  %v1372_v41 = vrot.slane %v1371_v47, 1  ;;  %v1385_v0 = vadd.f32 %v1384_v33, %v1383_v18  ;;  %v1412_v6 = vrot.slane %v1411_v48, 2 }
 0x1e0   : > { %v1399_v1 = vadd.f32 %v1398_v63, %v1397_v11  ;;  %v1425_v59 = vadd.f32 %v1424_v22, %v1423_v49  ;;  %v2094_v29 = vsel %vm2045_vm4, %v1345_v62, %v1331_v50  ;;  %v1334_v39 = vadd.f32 %v1333_v60, %v1332_v24  ;;  %v2197_v11 = vpop.f32.mrf.mxu0  ;;  %v4035_v24 = vld [vmem:[#allocation50_spill] sm:$0xff] }
 0x1e1   : > { %v1373_v3 = vadd.f32 %v1372_v41, %v1371_v47  ;;  %v1386_v57 = vrot.slane %v1385_v0, 1  ;;  %v1413_v30 = vadd.f32 %v1412_v6, %v1411_v48  ;;  %v2095_v44 = vsel %vm2047_vm5, %v1359_v51, %v2094_v29  ;;  %v4036_v47 = vld [vmem:[#allocation52_spill] sm:$0xff] }
 0x1e2   : > { %v1400_v26 = vrot.slane %v1399_v1, 1  ;;  %v1426_v7 = vrot.slane %v1425_v59, 2  ;;  %v1335_v13 = vrot.slane %v1334_v39, 2  ;;  %v1346_v2 = vsel %vm552_vm0, %v4030_v10, 0.0 }
 0x1e3   : > { %v1387_v21 = vadd.f32 %v1386_v57, %v1385_v0  ;;  %v1414_v54 = vrot.slane %v1413_v30, 1  ;;  %v2096_v15 = vsel %vm2049_vm6, %v1373_v3, %v2095_v44  ;;  %v1347_v52 = vrot.slane %v1346_v2, 4  ;;  %v2253_v3 = vpop.f32.mrf.mxu3 }
 0x1e4   : > { %v1401_v5 = vadd.f32 %v1400_v26, %v1399_v1  ;;  %v1427_v32 = vadd.f32 %v1426_v7, %v1425_v59  ;;  %v1336_v9 = vadd.f32 %v1335_v13, %v1334_v39  ;;  %v1360_v56 = vsel %vm552_vm0, %v4031_v8, 0.0  ;;  %v2212_v39 = vpop.f32.mrf.mxu2 }
 0x1e5   : > { %v1415_v40 = vadd.f32 %v1414_v54, %v1413_v30  ;;  %v2097_v55 = vsel %vm2051_vm7, %v1387_v21, %v2096_v15  ;;  %v1348_v53 = vadd.f32 %v1347_v52, %v1346_v2  ;;  %v1361_v37 = vrot.slane %v1360_v56, 4 }
 0x1e6   : > { %v1428_v19 = vrot.slane %v1427_v32, 1  ;;  %v2098_v36 = vsel %vm2053_vm8, %v1401_v5, %v2097_v55  ;;  %v1337_v50 = vrot.slane %v1336_v9, 1  ;;  %v1374_v23 = vsel %vm552_vm0, %v4032_v14, 0.0 }
 0x1e7   : > { %v2099_v12 = vsel %vm2055_vm9, %v1415_v40, %v2098_v36  ;;  %v1349_v35 = vrot.slane %v1348_v53, 2  ;;  %v1362_v25 = vadd.f32 %v1361_v37, %v1360_v56  ;;  %v1375_v58 = vrot.slane %v1374_v23, 4 }
 0x1e8   : > { %v1429_v27 = vadd.f32 %v1428_v19, %v1427_v32  ;;  %v1338_v20 = vadd.f32 %v1337_v50, %v1336_v9  ;;  %v1388_v16 = vsel %vm552_vm0, %v4033_v31, 0.0  ;;  %v1402_v28 = vsel %vm552_vm0, %v4034_v38, 0.0 }
 0x1e9   : > { %v1350_v34 = vadd.f32 %v1349_v35, %v1348_v53  ;;  %v1363_v18 = vrot.slane %v1362_v25, 2  ;;  %v1376_v61 = vadd.f32 %v1375_v58, %v1374_v23  ;;  %v1389_v4 = vrot.slane %v1388_v16, 4  ;;  %v2200_v23 = vpop.f32.mrf.mxu0 }
 0x1ea   : > { %v2100_v49 = vsel %vm2057_vm10, %v1429_v27, %v2099_v12  ;;  %v1403_v46 = vrot.slane %v1402_v28, 4  ;;  %v1416_v42 = vsel %vm552_vm0, %v4035_v24, 0.0  ;;  %v1430_v33 = vsel %vm552_vm0, %v4036_v47, 0.0 }
 0x1eb   : > { %2205 = vmatmul.f32.gmra.mxu0 %v2100_v49  ;;  %v1351_v48 = vrot.slane %v1350_v34, 1  ;;  %v1364_v62 = vadd.f32 %v1363_v18, %v1362_v25  ;;  %v1377_v63 = vrot.slane %v1376_v61, 2  ;;  %v1390_v22 = vadd.f32 %v1389_v4, %v1388_v16 }
 0x1ec   : > { %v1404_v60 = vadd.f32 %v1403_v46, %v1402_v28  ;;  %v1417_v51 = vrot.slane %v1416_v42, 4  ;;  %v1431_v41 = vrot.slane %v1430_v33, 4  ;;  %v2239_v0 = vadd.f32 %v2238_v45, %v2197_v11 }
 0x1ed   : > { %v1352_v6 = vadd.f32 %v1351_v48, %v1350_v34  ;;  %v1365_v1 = vrot.slane %v1364_v62, 1  ;;  %v1378_v59 = vadd.f32 %v1377_v63, %v1376_v61  ;;  %v1391_v29 = vrot.slane %v1390_v22, 2 }
 0x1ee   : > { %v1405_v57 = vrot.slane %v1404_v60, 2  ;;  %v1418_v30 = vadd.f32 %v1417_v51, %v1416_v42  ;;  %v1432_v44 = vadd.f32 %v1431_v41, %v1430_v33  ;;  %2262 = vst [vmem:[%s3833_s6] sm:$0xff] %v2239_v0  ;;  %v2251_v26 = vadd.f32 %v2250_v43, %v2209_v17 }
 0x1ef   : > { %v1366_v7 = vadd.f32 %v1365_v1, %v1364_v62  ;;  %v1379_v13 = vrot.slane %v1378_v59, 1  ;;  %v1392_v10 = vadd.f32 %v1391_v29, %v1390_v22  ;;  %v2101_v2 = vsel %vm2045_vm4, %v1352_v6, %v1338_v20 }
 0x1f0   : > { %v1406_v21 = vadd.f32 %v1405_v57, %v1404_v60  ;;  %v1419_v54 = vrot.slane %v1418_v30, 2  ;;  %v1433_v15 = vrot.slane %v1432_v44, 2  ;;  %2266 = vst [vmem:[%s3833_s6 + $0x20] sm:$0xff] %v2251_v26  ;;  %v2254_v52 = vadd.f32 %v2253_v3, %v2212_v39 }
 0x1f1   : > { %v1380_v5 = vadd.f32 %v1379_v13, %v1378_v59  ;;  %v1393_v32 = vrot.slane %v1392_v10, 1  ;;  %v2102_v9 = vsel %vm2047_vm5, %v1366_v7, %v2101_v2 }
 0x1f2   : > { %v1407_v8 = vrot.slane %v1406_v21, 1  ;;  %v1420_v56 = vadd.f32 %v1419_v54, %v1418_v30  ;;  %v1434_v40 = vadd.f32 %v1433_v15, %v1432_v44  ;;  %2267 = vst [vmem:[%s3833_s6 + $0x28] sm:$0xff] %v2254_v52 }
 0x1f3   : > { %v1394_v17 = vadd.f32 %v1393_v32, %v1392_v10  ;;  %v2103_v43 = vsel %vm2049_vm6, %v1380_v5, %v2102_v9 }
 0x1f4   : > { %v1408_v55 = vadd.f32 %v1407_v8, %v1406_v21  ;;  %v1421_v53 = vrot.slane %v1420_v56, 1  ;;  %v1435_v37 = vrot.slane %v1434_v40, 1 }
 0x1f5   : > { %v2104_v19 = vsel %vm2051_vm7, %v1394_v17, %v2103_v43 }
 0x1f6   : > { %v1422_v36 = vadd.f32 %v1421_v53, %v1420_v56  ;;  %v1436_v50 = vadd.f32 %v1435_v37, %v1434_v40  ;;  %v2105_v14 = vsel %vm2053_vm8, %v1408_v55, %v2104_v19 }
 0x1f7   : > { %v2241_v25 = vpop.f32.mrf.mxu1 }
 0x1f8   : > { %v2106_v12 = vsel %vm2055_vm9, %v1422_v36, %v2105_v14  ;;  %v2242_v58 = vadd.f32 %v2241_v25, %v2200_v23 }
 0x1f9   : > { %v2107_v35 = vsel %vm2057_vm10, %v1436_v50, %v2106_v12 }
 0x1fa   : > { %2246 = vmatmul.f32.gmra.mxu1 %v2107_v35  ;;  %2263 = vst [vmem:[%s3833_s6 + $0x8] sm:$0xff] %v2242_v58 }
 0x20d   : > { %v2215_v27 = vpop.f32.mrf.mxu2 }
 0x21f   : > { %v2256_v20 = vpop.f32.mrf.mxu3 }
 0x220   : > { %v2257_v31 = vadd.f32 %v2256_v20, %v2215_v27 }
 0x222   : > { %2268 = vst [vmem:[%s3833_s6 + $0x30] sm:$0xff] %v2257_v31 }
 0x229   : > { %v2203_v16 = vpop.f32.mrf.mxu0 }
 0x238   : > { %v2244_v38 = vpop.f32.mrf.mxu1 }
 0x239   : > { %v2245_v28 = vadd.f32 %v2244_v38, %v2203_v16 }
 0x23b   : > { %2264 = vst [vmem:[%s3833_s6 + $0x10] sm:$0xff] %v2245_v28 }
 0x24d   : > { %v2218_v34 = vpop.f32.mrf.mxu2 }
 0x25e   : > { %v2259_v18 = vpop.f32.mrf.mxu3 }
 0x25f   : > { %v2260_v61 = vadd.f32 %v2259_v18, %v2218_v34 }
 0x261   : > { %2269 = vst [vmem:[%s3833_s6 + $0x38] sm:$0xff] %v2260_v61 }
 0x268   : > { %v2206_v4 = vpop.f32.mrf.mxu0 }
 0x277   : > { %v2247_v11 = vpop.f32.mrf.mxu1 }
 0x278   : > { %v2248_v45 = vadd.f32 %v2247_v11, %v2206_v4 }
 0x27a   : > { %2265 = vst [vmem:[%s3833_s6 + $0x18] sm:$0xff] %v2248_v45 }
 0x27b   : > { %2502 = shalt.err (!%p2499_p5)
}
 0x27c   : > { %s2555_s30 = smov 128   ;;  %s2556_s4 = smov 8  }
 0x27d   : > { %2418 = dma.vmem_to_hbm [thread:$0]  (%p2617_p4), %s2286_s11, 1024, %s2288_s18, %s2271_s19, %s2555_s30, %s2555_s30, %s2556_s4  }
 0x27e PF: > { %p2424_p6 = scmp.ge.s32.totalorder %s2553_s17, 2  ;;  %s2302_s5 = sand.u32 1, %s2533_s12  }
 0x27f   : > { %s2303_s6 = scalar_lea.sflag [#allocation3], %s2302_s5 }
 0x280   : > { %p2421_p7 = pnand %p2424_p6, %p2624_p8 }
 0x282   : > { %p2422_p9 = pneg %p2421_p7 }
 0x284   : > { %2528 = dma.done.wait (%p2422_p9), %s2303_s6, 1024  }
 0x285   : > { %2530 = vsyncadd (%p2422_p9), %s2303_s6, 4294966272  ;;  %s16_s17 = sadd.s32 1, %s2553_s17   ;;  %s4037_s12 = smov %s2537_s13 }
 0x286   : > { %p13_p10 = scmp.ge.s32.totalorder %s16_s17, 4   ;;  %s4038_s13 = smov %s2541_s14 }
 0x287   : > { %s4039_s14 = smov %s2630_s25  ;;  %s4040_s15 = smov %s2549_s16 }
 0x288   : > { %s4041_s16 = smov %s4043_s20  ;;  %15 = sbr.rel (!%p13_p10) target bundleno = 4 (0x4), region = 69 }
 0x28d   :  { %2309 = vsyncpa [#allocation3], 1 }
 0x28e   :  { %2311 = vsyncpa [#allocation3 + $0x1], 1 }

</bundles_post_ra>
